<compile_context>
chip_gen: v6e
topology: v6e:2x2x1
jax: 0.10.0
libtpu: 0.0.40
codegen_flags: <defaults>
</compile_context>

<pallas_src>
import jax
import jax.numpy as jnp
from jax.experimental import pallas as pl
from jax.experimental.pallas import tpu as pltpu


def _round_up(x, m):
    return ((x + m - 1) // m) * m


# ----------------------------- Pallas kernels --------------------------------

def _conv_pool_relu_kernel(c00_ref, c01_ref, c10_ref, c11_ref, w_ref, b_ref, o_ref):
    # fused conv-as-matmul (the 4 pool-window corners) + 2x2 max-pool + bias + relu.
    # Same FLOPs as one big conv matmul -- just regrouped so the pool happens
    # in-register and only the pooled block is stored.
    w = w_ref[...]
    y00 = jnp.dot(c00_ref[...], w, preferred_element_type=jnp.float32)
    y01 = jnp.dot(c01_ref[...], w, preferred_element_type=jnp.float32)
    y10 = jnp.dot(c10_ref[...], w, preferred_element_type=jnp.float32)
    y11 = jnp.dot(c11_ref[...], w, preferred_element_type=jnp.float32)
    m = jnp.maximum(jnp.maximum(y00, y01), jnp.maximum(y10, y11))
    o_ref[...] = jnp.maximum(m + b_ref[...], 0.0)


def fused_conv_pool_relu(corners, w, b, *, rows_per_image, target_tm=512):
    """relu(max_pool2d(conv(x), 2)) for one layer.

    corners: 4 arrays (M, K), one per 2x2 pool-window corner, M = N*PH*PW rows.
    w: (K, Cout) weight matrix; b: (Cout,).  Returns (M, Cout) pooled activations.
    """
    M, K = corners[0].shape
    Cout = w.shape[1]
    n_imgs = M // rows_per_image
    # Large row tile (~512 rows when possible) that divides M exactly: few grid
    # steps (per-step overhead ~0.35us) and no jnp.pad / out[:M] copies.
    nb = max(1, min(n_imgs, max(1, target_tm // rows_per_image)))
    while n_imgs % nb:
        nb -= 1
    tm = nb * rows_per_image                       # multiple of 8 (144 / 16 per image)

    row_spec = pl.BlockSpec((tm, K), lambda i: (i, 0))
    resident = lambda shape: pl.BlockSpec(shape, lambda i: (0, 0))
    # TODO(synk): output last dim is Cout (10/20) < 128 lanes -> masked stores;
    # acceptable here since fusion already removed the big y1/y2 intermediates.
    return pl.pallas_call(
        _conv_pool_relu_kernel,
        out_shape=jax.ShapeDtypeStruct((M, Cout), jnp.float32),
        grid=(M // tm,),
        in_specs=[row_spec, row_spec, row_spec, row_spec,
                  resident((K, Cout)), resident((1, Cout))],
        out_specs=pl.BlockSpec((tm, Cout), lambda i: (i, 0)),
        compiler_params=pltpu.CompilerParams(dimension_semantics=("parallel",)),
    )(*corners, w, b.reshape(1, Cout))


def _mlp_head_kernel(x_ref, w1_ref, b1_ref, w2_ref, b2_ref, o_ref):
    h = jnp.dot(x_ref[...], w1_ref[...],
                preferred_element_type=jnp.float32) + b1_ref[...]
    h = jnp.maximum(h, 0.0)                          # relu(fc1(x))
    # F.dropout with training=False -> identity
    logits = jnp.dot(h, w2_ref[...],
                     preferred_element_type=jnp.float32) + b2_ref[...]
    m = jnp.max(logits, axis=-1, keepdims=True)
    lse = m + jnp.log(jnp.sum(jnp.exp(logits - m), axis=-1, keepdims=True))
    o_ref[...] = logits - lse                        # log_softmax(dim=1)


def mlp_head(x, w1, b1, w2, b2, *, target_tm=512):
    """Row-gridded fc1 -> relu -> fc2 -> log_softmax, weights resident in VMEM."""
    M, Kin = x.shape
    H = w1.shape[1]
    C = w2.shape[1]
    tm = min(target_tm, _round_up(M, 8))
    Mp = _round_up(M, tm)
    xp = x if Mp == M else jnp.pad(x, ((0, Mp - M), (0, 0)))
    resident = lambda shape: pl.BlockSpec(shape, lambda i: (0, 0))
    out = pl.pallas_call(
        _mlp_head_kernel,
        out_shape=jax.ShapeDtypeStruct((Mp, C), jnp.float32),
        grid=(Mp // tm,),
        in_specs=[pl.BlockSpec((tm, Kin), lambda i: (i, 0)),
                  resident((Kin, H)), resident((1, H)),
                  resident((H, C)), resident((1, C))],
        out_specs=pl.BlockSpec((tm, C), lambda i: (i, 0)),
        compiler_params=pltpu.CompilerParams(dimension_semantics=("parallel",)),
    )(xp, w1, b1.reshape(1, H), w2, b2.reshape(1, C))
    return out[:M]


# ------------------------------ host-side glue --------------------------------

def im2col_pool_corners(x, k):
    """x: (N, Cin, H, W) -> 4 corner patch matrices, each (N*PH*PW, Cin*k*k).

    Corner (dh, dw) row (n, ph, pw) holds the conv patch at conv position
    (2*ph+dh, 2*pw+dw); feature order (ci, kh, kw) matches the PyTorch
    Conv2d weight.reshape(Cout, Cin*k*k) flattening."""
    n, cin, h, w = x.shape
    oh, ow = h - k + 1, w - k + 1
    ph, pw = oh // 2, ow // 2
    cols = [x[:, :, dh:dh + oh, dw:dw + ow]
            for dh in range(k) for dw in range(k)]       # each (N, Cin, OH, OW)
    p = jnp.stack(cols, axis=2)                           # (N, Cin, k*k, OH, OW)
    p = p.transpose(0, 3, 4, 1, 2).reshape(n, oh, ow, cin * k * k)
    corners = tuple(
        p[:, dh:2 * ph + dh:2, dw:2 * pw + dw:2, :].reshape(n * ph * pw, cin * k * k)
        for dh in (0, 1) for dw in (0, 1))
    return corners, ph, pw


def init_params(key):
    def uniform(k, shape, fan_in):
        bound = float(fan_in) ** -0.5
        return jax.random.uniform(k, shape, jnp.float32, -bound, bound)

    ks = jax.random.split(key, 8)
    return {
        "w1": uniform(ks[0], (10, 1, 5, 5), 1 * 5 * 5),    # gabor_filter
        "b1": uniform(ks[1], (10,), 1 * 5 * 5),
        "w2": uniform(ks[2], (20, 10, 5, 5), 10 * 5 * 5),  # conv2
        "b2": uniform(ks[3], (20,), 10 * 5 * 5),
        "wf1": uniform(ks[4], (320, 50), 320),             # fc1 (stored (in,out))
        "bf1": uniform(ks[5], (50,), 320),
        "wf2": uniform(ks[6], (50, 10), 50),               # fc2
        "bf2": uniform(ks[7], (10,), 50),
    }


@jax.jit
def forward(params, x):
    """MyNetwork.forward (inference). x: (N, 1, 28, 28) float32 -> (N, 10)."""
    n = x.shape[0]

    # x = relu(max_pool2d(gabor_filter(x), 2))   -- one fused Pallas kernel
    c1, ph1, pw1 = im2col_pool_corners(x, 5)                 # 4 x (N*144, 25)
    w1m = params["w1"].reshape(10, -1).T                     # (25, 10)
    a1 = fused_conv_pool_relu(c1, w1m, params["b1"],
                              rows_per_image=ph1 * pw1)      # (N*144, 10)
    a1 = a1.reshape(n, ph1, pw1, 10).transpose(0, 3, 1, 2)   # NCHW (N, 10, 12, 12)

    # x = relu(max_pool2d(conv2_drop(conv2(x)), 2))   -- one fused Pallas kernel
    # TODO(synk): Dropout2d / F.dropout implemented for inference only (identity).
    c2, ph2, pw2 = im2col_pool_corners(a1, 5)                # 4 x (N*16, 250)
    w2m = params["w2"].reshape(20, -1).T                     # (250, 20)
    a2 = fused_conv_pool_relu(c2, w2m, params["b2"],
                              rows_per_image=ph2 * pw2)      # (N*16, 20)

    # x = x.view(-1, 320) in PyTorch NCHW order: (N, 20, 4, 4) -> (N, 320)
    flat = a2.reshape(n, ph2, pw2, 20).transpose(0, 3, 1, 2).reshape(n, 320)

    # fc1 -> relu -> dropout(id) -> fc2 -> log_softmax, one row-gridded kernel
    return mlp_head(flat, params["wf1"], params["bf1"],
                    params["wf2"], params["bf2"])


if __name__ == "__main__":
    key = jax.random.PRNGKey(0)
    pkey, xkey = jax.random.split(key)
    params = init_params(pkey)
    # MNIST-shaped input is required by fc1 (320 = 20*4*4 after two conv+pool)
    x = jax.random.normal(xkey, (2, 1, 28, 28), jnp.float32)
    out = forward(params, x)
    jax.block_until_ready(out)
    assert out.shape == (2, 10)
    print("KERNEL_OK")
</pallas_src>

<mosaic_0001>
module attributes {stable_mosaic.version = 11 : i64} {
  func.func @_conv_pool_relu_kernel(%arg0: i32, %arg1: memref<288x25xf32, #tpu.memory_space<vmem>>, %arg2: memref<288x25xf32, #tpu.memory_space<vmem>>, %arg3: memref<288x25xf32, #tpu.memory_space<vmem>>, %arg4: memref<288x25xf32, #tpu.memory_space<vmem>>, %arg5: memref<25x10xf32, #tpu.memory_space<vmem>>, %arg6: memref<1x10xf32, #tpu.memory_space<vmem>>, %arg7: memref<288x10xf32, #tpu.memory_space<vmem>>) attributes {dimension_semantics = [#tpu.dimension_semantics<parallel>], iteration_bounds = array<i64: 1>, scalar_prefetch = 0 : i64, scratch_operands = 0 : i64, tpu.core_type = #tpu.core_type<tc>, window_params = [{transform_indices = @transform_0, window_bounds = array<i64: 288, 25>}, {transform_indices = @transform_1, window_bounds = array<i64: 288, 25>}, {transform_indices = @transform_2, window_bounds = array<i64: 288, 25>}, {transform_indices = @transform_3, window_bounds = array<i64: 288, 25>}, {pipeline_mode = #tpu.pipeline_mode<synchronous>, transform_indices = @transform_4, window_bounds = array<i64: 25, 10>}, {pipeline_mode = #tpu.pipeline_mode<synchronous>, transform_indices = @transform_5, window_bounds = array<i64: 1, 10>}, {transform_indices = @transform_6, window_bounds = array<i64: 288, 10>}]} {
    %c0 = arith.constant 0 : index
    %c0_0 = arith.constant 0 : index
    %0 = vector.load %arg5[%c0, %c0_0] : memref<25x10xf32, #tpu.memory_space<vmem>>, vector<25x10xf32>
    %c0_1 = arith.constant 0 : index
    %c0_2 = arith.constant 0 : index
    %1 = vector.load %arg1[%c0_1, %c0_2] : memref<288x25xf32, #tpu.memory_space<vmem>>, vector<288x25xf32>
    %cst = arith.constant dense<0.000000e+00> : vector<288x10xf32>
    %2 = tpu.matmul %1, %0, %cst {dimension_numbers = #tpu.dot_dimension_numbers<[1], [0], [0], [1], [0, 0, 1, 1], [], []>} : vector<288x25xf32>, vector<25x10xf32>, vector<288x10xf32> -> vector<288x10xf32>
    %c0_3 = arith.constant 0 : index
    %c0_4 = arith.constant 0 : index
    %3 = vector.load %arg2[%c0_3, %c0_4] : memref<288x25xf32, #tpu.memory_space<vmem>>, vector<288x25xf32>
    %cst_5 = arith.constant dense<0.000000e+00> : vector<288x10xf32>
    %4 = tpu.matmul %3, %0, %cst_5 {dimension_numbers = #tpu.dot_dimension_numbers<[1], [0], [0], [1], [0, 0, 1, 1], [], []>} : vector<288x25xf32>, vector<25x10xf32>, vector<288x10xf32> -> vector<288x10xf32>
    %c0_6 = arith.constant 0 : index
    %c0_7 = arith.constant 0 : index
    %5 = vector.load %arg3[%c0_6, %c0_7] : memref<288x25xf32, #tpu.memory_space<vmem>>, vector<288x25xf32>
    %cst_8 = arith.constant dense<0.000000e+00> : vector<288x10xf32>
    %6 = tpu.matmul %5, %0, %cst_8 {dimension_numbers = #tpu.dot_dimension_numbers<[1], [0], [0], [1], [0, 0, 1, 1], [], []>} : vector<288x25xf32>, vector<25x10xf32>, vector<288x10xf32> -> vector<288x10xf32>
    %c0_9 = arith.constant 0 : index
    %c0_10 = arith.constant 0 : index
    %7 = vector.load %arg4[%c0_9, %c0_10] : memref<288x25xf32, #tpu.memory_space<vmem>>, vector<288x25xf32>
    %cst_11 = arith.constant dense<0.000000e+00> : vector<288x10xf32>
    %8 = tpu.matmul %7, %0, %cst_11 {dimension_numbers = #tpu.dot_dimension_numbers<[1], [0], [0], [1], [0, 0, 1, 1], [], []>} : vector<288x25xf32>, vector<25x10xf32>, vector<288x10xf32> -> vector<288x10xf32>
    %9 = arith.maximumf %2, %4 : vector<288x10xf32>
    %10 = arith.maximumf %6, %8 : vector<288x10xf32>
    %11 = arith.maximumf %9, %10 : vector<288x10xf32>
    %c0_12 = arith.constant 0 : index
    %c0_13 = arith.constant 0 : index
    %12 = vector.load %arg6[%c0_12, %c0_13] : memref<1x10xf32, #tpu.memory_space<vmem>>, vector<1x10xf32>
    %13 = vector.broadcast %12 : vector<1x10xf32> to vector<288x10xf32>
    %14 = arith.addf %11, %13 : vector<288x10xf32>
    %cst_14 = arith.constant 0.000000e+00 : f32
    %15 = vector.broadcast %cst_14 : f32 to vector<288x10xf32>
    %16 = arith.maximumf %14, %15 : vector<288x10xf32>
    %c0_15 = arith.constant 0 : index
    %c0_16 = arith.constant 0 : index
    %17 = vector.load %arg7[%c0_15, %c0_16] : memref<288x10xf32, #tpu.memory_space<vmem>>, vector<288x10xf32>
    tpu.vector_store %arg7[%c0_15, %c0_16], %16 {strides = array<i32>} : memref<288x10xf32, #tpu.memory_space<vmem>>, vector<288x10xf32>,
    return
  }
  func.func @transform_0(%arg0: i32) -> (i32, i32) {
    %c0_i32 = arith.constant 0 : i32
    %c0_i32_0 = arith.constant 0 : i32
    return %arg0, %c0_i32 : i32, i32
  }
  func.func @transform_1(%arg0: i32) -> (i32, i32) {
    %c0_i32 = arith.constant 0 : i32
    %c0_i32_0 = arith.constant 0 : i32
    return %arg0, %c0_i32 : i32, i32
  }
  func.func @transform_2(%arg0: i32) -> (i32, i32) {
    %c0_i32 = arith.constant 0 : i32
    %c0_i32_0 = arith.constant 0 : i32
    return %arg0, %c0_i32 : i32, i32
  }
  func.func @transform_3(%arg0: i32) -> (i32, i32) {
    %c0_i32 = arith.constant 0 : i32
    %c0_i32_0 = arith.constant 0 : i32
    return %arg0, %c0_i32 : i32, i32
  }
  func.func @transform_4(%arg0: i32) -> (i32, i32) {
    %c0_i32 = arith.constant 0 : i32
    %c0_i32_0 = arith.constant 0 : i32
    %c0_i32_1 = arith.constant 0 : i32
    return %c0_i32, %c0_i32_0 : i32, i32
  }
  func.func @transform_5(%arg0: i32) -> (i32, i32) {
    %c0_i32 = arith.constant 0 : i32
    %c0_i32_0 = arith.constant 0 : i32
    %c0_i32_1 = arith.constant 0 : i32
    return %c0_i32, %c0_i32_0 : i32, i32
  }
  func.func @transform_6(%arg0: i32) -> (i32, i32) {
    %c0_i32 = arith.constant 0 : i32
    %c0_i32_0 = arith.constant 0 : i32
    return %arg0, %c0_i32 : i32, i32
  }
}

module attributes {stable_mosaic.version = 11 : i64} {
  func.func @_conv_pool_relu_kernel(%arg0: i32, %arg1: memref<32x250xf32, #tpu.memory_space<vmem>>, %arg2: memref<32x250xf32, #tpu.memory_space<vmem>>, %arg3: memref<32x250xf32, #tpu.memory_space<vmem>>, %arg4: memref<32x250xf32, #tpu.memory_space<vmem>>, %arg5: memref<250x20xf32, #tpu.memory_space<vmem>>, %arg6: memref<1x20xf32, #tpu.memory_space<vmem>>, %arg7: memref<32x20xf32, #tpu.memory_space<vmem>>) attributes {dimension_semantics = [#tpu.dimension_semantics<parallel>], iteration_bounds = array<i64: 1>, scalar_prefetch = 0 : i64, scratch_operands = 0 : i64, tpu.core_type = #tpu.core_type<tc>, window_params = [{transform_indices = @transform_0, window_bounds = array<i64: 32, 250>}, {transform_indices = @transform_1, window_bounds = array<i64: 32, 250>}, {transform_indices = @transform_2, window_bounds = array<i64: 32, 250>}, {transform_indices = @transform_3, window_bounds = array<i64: 32, 250>}, {pipeline_mode = #tpu.pipeline_mode<synchronous>, transform_indices = @transform_4, window_bounds = array<i64: 250, 20>}, {pipeline_mode = #tpu.pipeline_mode<synchronous>, transform_indices = @transform_5, window_bounds = array<i64: 1, 20>}, {transform_indices = @transform_6, window_bounds = array<i64: 32, 20>}]} {
    %c0 = arith.constant 0 : index
    %c0_0 = arith.constant 0 : index
    %0 = vector.load %arg5[%c0, %c0_0] : memref<250x20xf32, #tpu.memory_space<vmem>>, vector<250x20xf32>
    %c0_1 = arith.constant 0 : index
    %c0_2 = arith.constant 0 : index
    %1 = vector.load %arg1[%c0_1, %c0_2] : memref<32x250xf32, #tpu.memory_space<vmem>>, vector<32x250xf32>
    %cst = arith.constant dense<0.000000e+00> : vector<32x20xf32>
    %2 = tpu.matmul %1, %0, %cst {dimension_numbers = #tpu.dot_dimension_numbers<[1], [0], [0], [1], [0, 0, 1, 1], [], []>} : vector<32x250xf32>, vector<250x20xf32>, vector<32x20xf32> -> vector<32x20xf32>
    %c0_3 = arith.constant 0 : index
    %c0_4 = arith.constant 0 : index
    %3 = vector.load %arg2[%c0_3, %c0_4] : memref<32x250xf32, #tpu.memory_space<vmem>>, vector<32x250xf32>
    %cst_5 = arith.constant dense<0.000000e+00> : vector<32x20xf32>
    %4 = tpu.matmul %3, %0, %cst_5 {dimension_numbers = #tpu.dot_dimension_numbers<[1], [0], [0], [1], [0, 0, 1, 1], [], []>} : vector<32x250xf32>, vector<250x20xf32>, vector<32x20xf32> -> vector<32x20xf32>
    %c0_6 = arith.constant 0 : index
    %c0_7 = arith.constant 0 : index
    %5 = vector.load %arg3[%c0_6, %c0_7] : memref<32x250xf32, #tpu.memory_space<vmem>>, vector<32x250xf32>
    %cst_8 = arith.constant dense<0.000000e+00> : vector<32x20xf32>
    %6 = tpu.matmul %5, %0, %cst_8 {dimension_numbers = #tpu.dot_dimension_numbers<[1], [0], [0], [1], [0, 0, 1, 1], [], []>} : vector<32x250xf32>, vector<250x20xf32>, vector<32x20xf32> -> vector<32x20xf32>
    %c0_9 = arith.constant 0 : index
    %c0_10 = arith.constant 0 : index
    %7 = vector.load %arg4[%c0_9, %c0_10] : memref<32x250xf32, #tpu.memory_space<vmem>>, vector<32x250xf32>
    %cst_11 = arith.constant dense<0.000000e+00> : vector<32x20xf32>
    %8 = tpu.matmul %7, %0, %cst_11 {dimension_numbers = #tpu.dot_dimension_numbers<[1], [0], [0], [1], [0, 0, 1, 1], [], []>} : vector<32x250xf32>, vector<250x20xf32>, vector<32x20xf32> -> vector<32x20xf32>
    %9 = arith.maximumf %2, %4 : vector<32x20xf32>
    %10 = arith.maximumf %6, %8 : vector<32x20xf32>
    %11 = arith.maximumf %9, %10 : vector<32x20xf32>
    %c0_12 = arith.constant 0 : index
    %c0_13 = arith.constant 0 : index
    %12 = vector.load %arg6[%c0_12, %c0_13] : memref<1x20xf32, #tpu.memory_space<vmem>>, vector<1x20xf32>
    %13 = vector.broadcast %12 : vector<1x20xf32> to vector<32x20xf32>
    %14 = arith.addf %11, %13 : vector<32x20xf32>
    %cst_14 = arith.constant 0.000000e+00 : f32
    %15 = vector.broadcast %cst_14 : f32 to vector<32x20xf32>
    %16 = arith.maximumf %14, %15 : vector<32x20xf32>
    %c0_15 = arith.constant 0 : index
    %c0_16 = arith.constant 0 : index
    %17 = vector.load %arg7[%c0_15, %c0_16] : memref<32x20xf32, #tpu.memory_space<vmem>>, vector<32x20xf32>
    tpu.vector_store %arg7[%c0_15, %c0_16], %16 {strides = array<i32>} : memref<32x20xf32, #tpu.memory_space<vmem>>, vector<32x20xf32>,
    return
  }
  func.func @transform_0(%arg0: i32) -> (i32, i32) {
    %c0_i32 = arith.constant 0 : i32
    %c0_i32_0 = arith.constant 0 : i32
    return %arg0, %c0_i32 : i32, i32
  }
  func.func @transform_1(%arg0: i32) -> (i32, i32) {
    %c0_i32 = arith.constant 0 : i32
    %c0_i32_0 = arith.constant 0 : i32
    return %arg0, %c0_i32 : i32, i32
  }
  func.func @transform_2(%arg0: i32) -> (i32, i32) {
    %c0_i32 = arith.constant 0 : i32
    %c0_i32_0 = arith.constant 0 : i32
    return %arg0, %c0_i32 : i32, i32
  }
  func.func @transform_3(%arg0: i32) -> (i32, i32) {
    %c0_i32 = arith.constant 0 : i32
    %c0_i32_0 = arith.constant 0 : i32
    return %arg0, %c0_i32 : i32, i32
  }
  func.func @transform_4(%arg0: i32) -> (i32, i32) {
    %c0_i32 = arith.constant 0 : i32
    %c0_i32_0 = arith.constant 0 : i32
    %c0_i32_1 = arith.constant 0 : i32
    return %c0_i32, %c0_i32_0 : i32, i32
  }
  func.func @transform_5(%arg0: i32) -> (i32, i32) {
    %c0_i32 = arith.constant 0 : i32
    %c0_i32_0 = arith.constant 0 : i32
    %c0_i32_1 = arith.constant 0 : i32
    return %c0_i32, %c0_i32_0 : i32, i32
  }
  func.func @transform_6(%arg0: i32) -> (i32, i32) {
    %c0_i32 = arith.constant 0 : i32
    %c0_i32_0 = arith.constant 0 : i32
    return %arg0, %c0_i32 : i32, i32
  }
}

module attributes {stable_mosaic.version = 11 : i64} {
  func.func @_mlp_head_kernel(%arg0: i32, %arg1: memref<8x320xf32, #tpu.memory_space<vmem>>, %arg2: memref<320x50xf32, #tpu.memory_space<vmem>>, %arg3: memref<1x50xf32, #tpu.memory_space<vmem>>, %arg4: memref<50x10xf32, #tpu.memory_space<vmem>>, %arg5: memref<1x10xf32, #tpu.memory_space<vmem>>, %arg6: memref<8x10xf32, #tpu.memory_space<vmem>>) attributes {dimension_semantics = [#tpu.dimension_semantics<parallel>], iteration_bounds = array<i64: 1>, scalar_prefetch = 0 : i64, scratch_operands = 0 : i64, tpu.core_type = #tpu.core_type<tc>, window_params = [{transform_indices = @transform_0, window_bounds = array<i64: 8, 320>}, {pipeline_mode = #tpu.pipeline_mode<synchronous>, transform_indices = @transform_1, window_bounds = array<i64: 320, 50>}, {pipeline_mode = #tpu.pipeline_mode<synchronous>, transform_indices = @transform_2, window_bounds = array<i64: 1, 50>}, {pipeline_mode = #tpu.pipeline_mode<synchronous>, transform_indices = @transform_3, window_bounds = array<i64: 50, 10>}, {pipeline_mode = #tpu.pipeline_mode<synchronous>, transform_indices = @transform_4, window_bounds = array<i64: 1, 10>}, {transform_indices = @transform_5, window_bounds = array<i64: 8, 10>}]} {
    %c0 = arith.constant 0 : index
    %c0_0 = arith.constant 0 : index
    %0 = vector.load %arg1[%c0, %c0_0] : memref<8x320xf32, #tpu.memory_space<vmem>>, vector<8x320xf32>
    %c0_1 = arith.constant 0 : index
    %c0_2 = arith.constant 0 : index
    %1 = vector.load %arg2[%c0_1, %c0_2] : memref<320x50xf32, #tpu.memory_space<vmem>>, vector<320x50xf32>
    %cst = arith.constant dense<0.000000e+00> : vector<8x50xf32>
    %2 = tpu.matmul %0, %1, %cst {dimension_numbers = #tpu.dot_dimension_numbers<[1], [0], [0], [1], [0, 0, 1, 1], [], []>} : vector<8x320xf32>, vector<320x50xf32>, vector<8x50xf32> -> vector<8x50xf32>
    %c0_3 = arith.constant 0 : index
    %c0_4 = arith.constant 0 : index
    %3 = vector.load %arg3[%c0_3, %c0_4] : memref<1x50xf32, #tpu.memory_space<vmem>>, vector<1x50xf32>
    %4 = vector.broadcast %3 : vector<1x50xf32> to vector<8x50xf32>
    %5 = arith.addf %2, %4 : vector<8x50xf32>
    %cst_5 = arith.constant 0.000000e+00 : f32
    %6 = vector.broadcast %cst_5 : f32 to vector<8x50xf32>
    %7 = arith.maximumf %5, %6 : vector<8x50xf32>
    %c0_6 = arith.constant 0 : index
    %c0_7 = arith.constant 0 : index
    %8 = vector.load %arg4[%c0_6, %c0_7] : memref<50x10xf32, #tpu.memory_space<vmem>>, vector<50x10xf32>
    %cst_8 = arith.constant dense<0.000000e+00> : vector<8x10xf32>
    %9 = tpu.matmul %7, %8, %cst_8 {dimension_numbers = #tpu.dot_dimension_numbers<[1], [0], [0], [1], [0, 0, 1, 1], [], []>} : vector<8x50xf32>, vector<50x10xf32>, vector<8x10xf32> -> vector<8x10xf32>
    %c0_9 = arith.constant 0 : index
    %c0_10 = arith.constant 0 : index
    %10 = vector.load %arg5[%c0_9, %c0_10] : memref<1x10xf32, #tpu.memory_space<vmem>>, vector<1x10xf32>
    %11 = vector.broadcast %10 : vector<1x10xf32> to vector<8x10xf32>
    %12 = arith.addf %9, %11 : vector<8x10xf32>
    %cst_11 = arith.constant dense<0xFF800000> : vector<8xf32>
    %13 = vector.multi_reduction <maximumf>, %12, %cst_11 [1] : vector<8x10xf32> to vector<8xf32>
    %14 = vector.shape_cast %13 : vector<8xf32> to vector<8x1xf32>
    %15 = vector.broadcast %14 : vector<8x1xf32> to vector<8x10xf32>
    %16 = arith.subf %12, %15 : vector<8x10xf32>
    %17 = math.exp %16 : vector<8x10xf32>
    %cst_12 = arith.constant dense<0.000000e+00> : vector<8xf32>
    %18 = vector.multi_reduction <add>, %17, %cst_12 [1] : vector<8x10xf32> to vector<8xf32>
    %19 = vector.shape_cast %18 : vector<8xf32> to vector<8x1xf32>
    %20 = math.log %19 : vector<8x1xf32>
    %21 = arith.addf %14, %20 : vector<8x1xf32>
    %22 = vector.broadcast %21 : vector<8x1xf32> to vector<8x10xf32>
    %23 = arith.subf %12, %22 : vector<8x10xf32>
    %c0_13 = arith.constant 0 : index
    %c0_14 = arith.constant 0 : index
    %24 = vector.load %arg6[%c0_13, %c0_14] : memref<8x10xf32, #tpu.memory_space<vmem>>, vector<8x10xf32>
    tpu.vector_store %arg6[%c0_13, %c0_14], %23 {strides = array<i32>} : memref<8x10xf32, #tpu.memory_space<vmem>>, vector<8x10xf32>,
    return
  }
  func.func @transform_0(%arg0: i32) -> (i32, i32) {
    %c0_i32 = arith.constant 0 : i32
    %c0_i32_0 = arith.constant 0 : i32
    return %arg0, %c0_i32 : i32, i32
  }
  func.func @transform_1(%arg0: i32) -> (i32, i32) {
    %c0_i32 = arith.constant 0 : i32
    %c0_i32_0 = arith.constant 0 : i32
    %c0_i32_1 = arith.constant 0 : i32
    return %c0_i32, %c0_i32_0 : i32, i32
  }
  func.func @transform_2(%arg0: i32) -> (i32, i32) {
    %c0_i32 = arith.constant 0 : i32
    %c0_i32_0 = arith.constant 0 : i32
    %c0_i32_1 = arith.constant 0 : i32
    return %c0_i32, %c0_i32_0 : i32, i32
  }
  func.func @transform_3(%arg0: i32) -> (i32, i32) {
    %c0_i32 = arith.constant 0 : i32
    %c0_i32_0 = arith.constant 0 : i32
    %c0_i32_1 = arith.constant 0 : i32
    return %c0_i32, %c0_i32_0 : i32, i32
  }
  func.func @transform_4(%arg0: i32) -> (i32, i32) {
    %c0_i32 = arith.constant 0 : i32
    %c0_i32_0 = arith.constant 0 : i32
    %c0_i32_1 = arith.constant 0 : i32
    return %c0_i32, %c0_i32_0 : i32, i32
  }
  func.func @transform_5(%arg0: i32) -> (i32, i32) {
    %c0_i32 = arith.constant 0 : i32
    %c0_i32_0 = arith.constant 0 : i32
    return %arg0, %c0_i32 : i32, i32
  }
}

</mosaic_0001>

<bundles_post_ra>
// kernel: forward.3
= control target key start
LH: loop header
LB: loop body
LE: loop exit
PB: predicated region body
PF: predicated region fallthrough
CT: control target
= control target key end

     0   :  { %vm172_vm0 = vcmask 1040384   ;;  %vm63_vm1 = vcmask 203776   ;;  %vm1775_vm2 = vcmask 80896   ;;  %s3523_s4 = inlined_call_operand.vmem [shape: f32[25,10], index: 4, kind: input, shape index: {}]   ;;  %s3524_s0 = inlined_call_operand.vmem [shape: f32[288,25], index: 0, kind: input, shape index: {}]   ;;  %s3525_s1 = inlined_call_operand.vmem [shape: f32[288,25], index: 1, kind: input, shape index: {}]   ;;  %s3526_s2 = inlined_call_operand.vmem [shape: f32[288,25], index: 2, kind: input, shape index: {}]   ;;  %s3527_s3 = inlined_call_operand.vmem [shape: f32[288,25], index: 3, kind: input, shape index: {}]   ;;  %s3528_s5 = inlined_call_operand.vmem [shape: f32[1,10], index: 5, kind: input, shape index: {}]   ;;  %s3529_s6 = inlined_call_operand.vmem [shape: f32[288,10], index: 6, kind: output, shape index: {}]  }
   0x1   :  { %v26_v0 = vld [vmem:[%s3523_s4 + $0x18] sm:$0x1]  ;;  %v25_v1 = vld [vmem:[%s3523_s4 + $0x10] sm:$0xff]  ;;  %v24_v2 = vld [vmem:[%s3523_s4 + $0x8] sm:$0xff] }
   0x2   :  { %2125 = vmatprep.subr.msk.mxu0 %vm172_vm0, %v26_v0  ;;  %2187 = vmatprep.subr.msk.mxu1 %vm172_vm0, %v26_v0  ;;  %v2424_v3 = vld [vmem:[%s3523_s4] sm:$0xff]  ;;  %v28_v6 = vld [vmem:[%s3524_s0 + $0x8] sm:$0xff]  ;;  %v29_v8 = vld [vmem:[%s3524_s0 + $0x10] sm:$0xff] }
   0x3   :  { %2126 = vmatpush3.msk.msra.mxu0 %vm172_vm0, %v26_v0  ;;  %2188 = vmatpush3.msk.msra.mxu1 %vm172_vm0, %v26_v0  ;;  %v27_v4 = vld [vmem:[%s3524_s0] sm:$0xff]  ;;  %v422_v7 = vld [vmem:[%s3525_s1 + $0x8] sm:$0xff]  ;;  %v423_v9 = vld [vmem:[%s3525_s1 + $0x10] sm:$0xff] }
   0x4   :  { %2127 = vmatprep.subr.mxu0 %v25_v1  ;;  %2189 = vmatprep.subr.mxu1 %v25_v1  ;;  %v421_v5 = vld [vmem:[%s3525_s1] sm:$0xff]  ;;  %v30_v10 = vld [vmem:[%s3524_s0 + $0x18] sm:$0xff]  ;;  %v32_v14 = vld [vmem:[%s3524_s0 + $0x28] sm:$0xff] }
   0x5   :  { %2128 = vmatpush3.msra.mxu0 %v25_v1  ;;  %2190 = vmatpush3.msra.mxu1 %v25_v1  ;;  %v424_v11 = vld [vmem:[%s3525_s1 + $0x18] sm:$0xff]  ;;  %v31_v12 = vld [vmem:[%s3524_s0 + $0x20] sm:$0xff]  ;;  %v426_v15 = vld [vmem:[%s3525_s1 + $0x28] sm:$0xff] }
   0x6   :  { %2129 = vmatprep.subr.mxu0 %v24_v2  ;;  %2191 = vmatprep.subr.mxu1 %v24_v2  ;;  %v425_v13 = vld [vmem:[%s3525_s1 + $0x20] sm:$0xff]  ;;  %v33_v16 = vld [vmem:[%s3524_s0 + $0x30] sm:$0xff]  ;;  %v34_v18 = vld [vmem:[%s3524_s0 + $0x38] sm:$0xff] }
   0x7   :  { %2130 = vmatpush3.msra.mxu0 %v24_v2  ;;  %2192 = vmatpush3.msra.mxu1 %v24_v2  ;;  %v427_v17 = vld [vmem:[%s3525_s1 + $0x30] sm:$0xff]  ;;  %v428_v19 = vld [vmem:[%s3525_s1 + $0x38] sm:$0xff]  ;;  %v35_v20 = vld [vmem:[%s3524_s0 + $0x40] sm:$0xff] }
   0x8   :  { %2131 = vmatprep.subr.mxu0 %v2424_v3  ;;  %2193 = vmatprep.subr.mxu1 %v2424_v3  ;;  %v429_v21 = vld [vmem:[%s3525_s1 + $0x40] sm:$0xff]  ;;  %v36_v22 = vld [vmem:[%s3524_s0 + $0x48] sm:$0xff]  ;;  %v37_v24 = vld [vmem:[%s3524_s0 + $0x50] sm:$0xff] }
   0x9   :  { %2132 = vmatpush3.msra.mxu0 %v2424_v3  ;;  %2133 = vmatprep.mubr.msk.f32.mxu0 %vm63_vm1, %v27_v4  ;;  %v430_v23 = vld [vmem:[%s3525_s1 + $0x48] sm:$0xff]  ;;  %v431_v25 = vld [vmem:[%s3525_s1 + $0x50] sm:$0xff]  ;;  %v38_v26 = vld [vmem:[%s3524_s0 + $0x58] sm:$0xff] }
   0xa   :  { %2194 = vmatpush3.msra.mxu1 %v2424_v3  ;;  %2195 = vmatprep.mubr.msk.f32.mxu1 %vm63_vm1, %v421_v5  ;;  %v432_v27 = vld [vmem:[%s3525_s1 + $0x58] sm:$0xff]  ;;  %v39_v28 = vld [vmem:[%s3524_s0 + $0x60] sm:$0xff]  ;;  %v40_v30 = vld [vmem:[%s3524_s0 + $0x68] sm:$0xff] }
   0xb   :  { %2134 = vmatmul.mubr.msk.f32.vlgmr.msra.gmra.mxu0 %vm63_vm1, %v28_v6  ;;  %2196 = vmatmul.mubr.msk.f32.vlgmr.msra.gmra.mxu1 %vm63_vm1, %v422_v7  ;;  %v433_v29 = vld [vmem:[%s3525_s1 + $0x60] sm:$0xff]  ;;  %v434_v31 = vld [vmem:[%s3525_s1 + $0x68] sm:$0xff]  ;;  %v41_v32 = vld [vmem:[%s3524_s0 + $0x70] sm:$0xff] }
   0xc   :  { %2249 = vmatprep.subr.msk.mxu0 %vm172_vm0, %v26_v0  ;;  %2311 = vmatprep.subr.msk.mxu1 %vm172_vm0, %v26_v0  ;;  %v435_v33 = vld [vmem:[%s3525_s1 + $0x70] sm:$0xff]  ;;  %v42_v34 = vld [vmem:[%s3524_s0 + $0x78] sm:$0xff]  ;;  %v43_v36 = vld [vmem:[%s3524_s0 + $0x80] sm:$0xff] }
   0xd   :  { %2250 = vmatpush3.msk.msra.mxu0 %vm172_vm0, %v26_v0  ;;  %2312 = vmatpush3.msk.msra.mxu1 %vm172_vm0, %v26_v0  ;;  %v436_v35 = vld [vmem:[%s3525_s1 + $0x78] sm:$0xff]  ;;  %v437_v37 = vld [vmem:[%s3525_s1 + $0x80] sm:$0xff]  ;;  %v44_v38 = vld [vmem:[%s3524_s0 + $0x88] sm:$0xff] }
   0xe   :  { %2136 = vmatprep.mubr.msk.f32.mxu0 %vm63_vm1, %v29_v8  ;;  %2198 = vmatprep.mubr.msk.f32.mxu1 %vm63_vm1, %v423_v9  ;;  %v438_v39 = vld [vmem:[%s3525_s1 + $0x88] sm:$0xff]  ;;  %v45_v40 = vld [vmem:[%s3524_s0 + $0x90] sm:$0xff]  ;;  %v46_v42 = vld [vmem:[%s3524_s0 + $0x98] sm:$0xff] }
   0xf   :  { %2137 = vmatmul.mubr.msk.f32.gmra.mxu0 %vm63_vm1, %v30_v10  ;;  %2199 = vmatmul.mubr.msk.f32.gmra.mxu1 %vm63_vm1, %v424_v11  ;;  %v439_v41 = vld [vmem:[%s3525_s1 + $0x90] sm:$0xff]  ;;  %v440_v43 = vld [vmem:[%s3525_s1 + $0x98] sm:$0xff]  ;;  %v47_v44 = vld [vmem:[%s3524_s0 + $0xa0] sm:$0xff] }
  0x10   :  { %2139 = vmatprep.mubr.msk.f32.mxu0 %vm63_vm1, %v31_v12  ;;  %2201 = vmatprep.mubr.msk.f32.mxu1 %vm63_vm1, %v425_v13  ;;  %v441_v45 = vld [vmem:[%s3525_s1 + $0xa0] sm:$0xff]  ;;  %v48_v46 = vld [vmem:[%s3524_s0 + $0xa8] sm:$0xff]  ;;  %v49_v48 = vld [vmem:[%s3524_s0 + $0xb0] sm:$0xff] }
  0x11   :  { %2251 = vmatprep.subr.mxu0 %v25_v1  ;;  %2313 = vmatprep.subr.mxu1 %v25_v1  ;;  %v442_v47 = vld [vmem:[%s3525_s1 + $0xa8] sm:$0xff]  ;;  %v443_v49 = vld [vmem:[%s3525_s1 + $0xb0] sm:$0xff]  ;;  %v50_v50 = vld [vmem:[%s3524_s0 + $0xb8] sm:$0xff] }
  0x12   :  { %2252 = vmatpush3.msra.mxu0 %v25_v1  ;;  %2314 = vmatpush3.msra.mxu1 %v25_v1  ;;  %v444_v51 = vld [vmem:[%s3525_s1 + $0xb8] sm:$0xff]  ;;  %v51_v52 = vld [vmem:[%s3524_s0 + $0xc0] sm:$0xff]  ;;  %v52_v54 = vld [vmem:[%s3524_s0 + $0xc8] sm:$0xff] }
  0x13   :  { %2140 = vmatmul.mubr.msk.f32.gmra.mxu0 %vm63_vm1, %v32_v14  ;;  %2202 = vmatmul.mubr.msk.f32.gmra.mxu1 %vm63_vm1, %v426_v15  ;;  %v445_v53 = vld [vmem:[%s3525_s1 + $0xc0] sm:$0xff]  ;;  %v446_v55 = vld [vmem:[%s3525_s1 + $0xc8] sm:$0xff]  ;;  %v53_v56 = vld [vmem:[%s3524_s0 + $0xd0] sm:$0xff] }
  0x14   :  { %2142 = vmatprep.mubr.msk.f32.mxu0 %vm63_vm1, %v33_v16  ;;  %2204 = vmatprep.mubr.msk.f32.mxu1 %vm63_vm1, %v427_v17  ;;  %v447_v57 = vld [vmem:[%s3525_s1 + $0xd0] sm:$0xff]  ;;  %v54_v58 = vld [vmem:[%s3524_s0 + $0xd8] sm:$0xff]  ;;  %v55_v60 = vld [vmem:[%s3524_s0 + $0xe0] sm:$0xff] }
  0x15   :  { %2253 = vmatprep.subr.mxu0 %v24_v2  ;;  %2315 = vmatprep.subr.mxu1 %v24_v2  ;;  %v448_v59 = vld [vmem:[%s3525_s1 + $0xd8] sm:$0xff]  ;;  %v449_v61 = vld [vmem:[%s3525_s1 + $0xe0] sm:$0xff]  ;;  %v56_v62 = vld [vmem:[%s3524_s0 + $0xe8] sm:$0xff] }
  0x16   :  { %2254 = vmatpush3.msra.mxu0 %v24_v2  ;;  %2316 = vmatpush3.msra.mxu1 %v24_v2  ;;  %v450_v63 = vld [vmem:[%s3525_s1 + $0xe8] sm:$0xff]  ;;  %v57_v0 = vld [vmem:[%s3524_s0 + $0xf0] sm:$0xff]  ;;  %v58_v2 = vld [vmem:[%s3524_s0 + $0xf8] sm:$0xff] }
  0x17   :  { %2143 = vmatmul.mubr.msk.f32.gmra.mxu0 %vm63_vm1, %v34_v18  ;;  %2205 = vmatmul.mubr.msk.f32.gmra.mxu1 %vm63_vm1, %v428_v19  ;;  %v451_v1 = vld [vmem:[%s3525_s1 + $0xf0] sm:$0xff]  ;;  %v59_v4 = vld [vmem:[%s3524_s0 + $0x100] sm:$0xff]  ;;  %v60_v6 = vld [vmem:[%s3524_s0 + $0x108] sm:$0xff] }
  0x18   :  { %2145 = vmatprep.mubr.msk.f32.mxu0 %vm63_vm1, %v35_v20  ;;  %2207 = vmatprep.mubr.msk.f32.mxu1 %vm63_vm1, %v429_v21  ;;  %v453_v5 = vld [vmem:[%s3525_s1 + $0x100] sm:$0xff]  ;;  %v454_v7 = vld [vmem:[%s3525_s1 + $0x108] sm:$0xff]  ;;  %v61_v8 = vld [vmem:[%s3524_s0 + $0x110] sm:$0xff] }
  0x19   :  { %2255 = vmatprep.subr.mxu0 %v2424_v3  ;;  %2317 = vmatprep.subr.mxu1 %v2424_v3  ;;  %v455_v9 = vld [vmem:[%s3525_s1 + $0x110] sm:$0xff]  ;;  %v62_v10 = vld [vmem:[%s3524_s0 + $0x118] sm:$0xff]  ;;  %v810_v12 = vld [vmem:[%s3526_s2] sm:$0xff] }
  0x1a   :  { %2256 = vmatpush3.msra.mxu0 %v2424_v3  ;;  %2318 = vmatpush3.msra.mxu1 %v2424_v3  ;;  %v452_v3 = vld [vmem:[%s3525_s1 + $0xf8] sm:$0xff]  ;;  %v1199_v13 = vld [vmem:[%s3527_s3] sm:$0xff]  ;;  %v811_v14 = vld [vmem:[%s3526_s2 + $0x8] sm:$0xff] }
  0x1b   :  { %2146 = vmatmul.mubr.msk.f32.gmra.mxu0 %vm63_vm1, %v36_v22  ;;  %2208 = vmatmul.mubr.msk.f32.gmra.mxu1 %vm63_vm1, %v430_v23  ;;  %v456_v11 = vld [vmem:[%s3525_s1 + $0x118] sm:$0xff]  ;;  %v1200_v15 = vld [vmem:[%s3527_s3 + $0x8] sm:$0xff]  ;;  %v812_v16 = vld [vmem:[%s3526_s2 + $0x10] sm:$0xff] }
  0x1c   :  { %2148 = vmatprep.mubr.msk.f32.mxu0 %vm63_vm1, %v37_v24  ;;  %2210 = vmatprep.mubr.msk.f32.mxu1 %vm63_vm1, %v431_v25  ;;  %v1201_v17 = vld [vmem:[%s3527_s3 + $0x10] sm:$0xff]  ;;  %v813_v18 = vld [vmem:[%s3526_s2 + $0x18] sm:$0xff]  ;;  %v814_v20 = vld [vmem:[%s3526_s2 + $0x20] sm:$0xff] }
  0x1d   :  { %v1202_v19 = vld [vmem:[%s3527_s3 + $0x18] sm:$0xff]  ;;  %v1203_v21 = vld [vmem:[%s3527_s3 + $0x20] sm:$0xff]  ;;  %v815_v22 = vld [vmem:[%s3526_s2 + $0x28] sm:$0xff] }
  0x1e   :  { %v1204_v23 = vld [vmem:[%s3527_s3 + $0x28] sm:$0xff]  ;;  %v816_v24 = vld [vmem:[%s3526_s2 + $0x30] sm:$0xff] }
  0x1f   :  { %2149 = vmatmul.mubr.msk.f32.gmra.mxu0 %vm63_vm1, %v38_v26  ;;  %2211 = vmatmul.mubr.msk.f32.gmra.mxu1 %vm63_vm1, %v432_v27  ;;  %v1205_v25 = vld [vmem:[%s3527_s3 + $0x30] sm:$0xff]  ;;  %v817_v26 = vld [vmem:[%s3526_s2 + $0x38] sm:$0xff] }
  0x20   :  { %2151 = vmatprep.mubr.msk.f32.mxu0 %vm63_vm1, %v39_v28  ;;  %2213 = vmatprep.mubr.msk.f32.mxu1 %vm63_vm1, %v433_v29  ;;  %v1206_v27 = vld [vmem:[%s3527_s3 + $0x38] sm:$0xff]  ;;  %v818_v28 = vld [vmem:[%s3526_s2 + $0x40] sm:$0xff] }
  0x21   :  { %v1207_v29 = vld [vmem:[%s3527_s3 + $0x40] sm:$0xff] }
  0x23   :  { %2152 = vmatmul.mubr.msk.f32.gmra.mxu0 %vm63_vm1, %v40_v30  ;;  %2214 = vmatmul.mubr.msk.f32.gmra.mxu1 %vm63_vm1, %v434_v31  ;;  %v819_v30 = vld [vmem:[%s3526_s2 + $0x48] sm:$0xff] }
  0x24   :  { %2154 = vmatprep.mubr.msk.f32.mxu0 %vm63_vm1, %v41_v32  ;;  %2216 = vmatprep.mubr.msk.f32.mxu1 %vm63_vm1, %v435_v33  ;;  %v1208_v31 = vld [vmem:[%s3527_s3 + $0x48] sm:$0xff]  ;;  %v820_v32 = vld [vmem:[%s3526_s2 + $0x50] sm:$0xff] }
  0x25   :  { %v1209_v33 = vld [vmem:[%s3527_s3 + $0x50] sm:$0xff] }
  0x27   :  { %2155 = vmatmul.mubr.msk.f32.gmra.mxu0 %vm63_vm1, %v42_v34  ;;  %2217 = vmatmul.mubr.msk.f32.gmra.mxu1 %vm63_vm1, %v436_v35  ;;  %v821_v34 = vld [vmem:[%s3526_s2 + $0x58] sm:$0xff] }
  0x28   :  { %2157 = vmatprep.mubr.msk.f32.mxu0 %vm63_vm1, %v43_v36  ;;  %2219 = vmatprep.mubr.msk.f32.mxu1 %vm63_vm1, %v437_v37  ;;  %v1210_v35 = vld [vmem:[%s3527_s3 + $0x58] sm:$0xff]  ;;  %v822_v36 = vld [vmem:[%s3526_s2 + $0x60] sm:$0xff] }
  0x29   :  { %v1211_v37 = vld [vmem:[%s3527_s3 + $0x60] sm:$0xff] }
  0x2b   :  { %2158 = vmatmul.mubr.msk.f32.gmra.mxu0 %vm63_vm1, %v44_v38  ;;  %2220 = vmatmul.mubr.msk.f32.gmra.mxu1 %vm63_vm1, %v438_v39  ;;  %v823_v38 = vld [vmem:[%s3526_s2 + $0x68] sm:$0xff] }
  0x2c   :  { %2160 = vmatprep.mubr.msk.f32.mxu0 %vm63_vm1, %v45_v40  ;;  %2222 = vmatprep.mubr.msk.f32.mxu1 %vm63_vm1, %v439_v41  ;;  %v1212_v39 = vld [vmem:[%s3527_s3 + $0x68] sm:$0xff]  ;;  %v824_v40 = vld [vmem:[%s3526_s2 + $0x70] sm:$0xff] }
  0x2d   :  { %v1213_v41 = vld [vmem:[%s3527_s3 + $0x70] sm:$0xff] }
  0x2f   :  { %2161 = vmatmul.mubr.msk.f32.gmra.mxu0 %vm63_vm1, %v46_v42  ;;  %2223 = vmatmul.mubr.msk.f32.gmra.mxu1 %vm63_vm1, %v440_v43  ;;  %v825_v42 = vld [vmem:[%s3526_s2 + $0x78] sm:$0xff] }
  0x30   :  { %2163 = vmatprep.mubr.msk.f32.mxu0 %vm63_vm1, %v47_v44  ;;  %2225 = vmatprep.mubr.msk.f32.mxu1 %vm63_vm1, %v441_v45  ;;  %v1214_v43 = vld [vmem:[%s3527_s3 + $0x78] sm:$0xff]  ;;  %v826_v44 = vld [vmem:[%s3526_s2 + $0x80] sm:$0xff] }
  0x31   :  { %v1215_v45 = vld [vmem:[%s3527_s3 + $0x80] sm:$0xff] }
  0x33   :  { %2164 = vmatmul.mubr.msk.f32.gmra.mxu0 %vm63_vm1, %v48_v46  ;;  %2226 = vmatmul.mubr.msk.f32.gmra.mxu1 %vm63_vm1, %v442_v47  ;;  %v827_v46 = vld [vmem:[%s3526_s2 + $0x88] sm:$0xff] }
  0x34   :  { %2166 = vmatprep.mubr.msk.f32.mxu0 %vm63_vm1, %v49_v48  ;;  %2228 = vmatprep.mubr.msk.f32.mxu1 %vm63_vm1, %v443_v49  ;;  %v1216_v47 = vld [vmem:[%s3527_s3 + $0x88] sm:$0xff]  ;;  %v828_v48 = vld [vmem:[%s3526_s2 + $0x90] sm:$0xff] }
  0x35   :  { %v1217_v49 = vld [vmem:[%s3527_s3 + $0x90] sm:$0xff] }
  0x37   :  { %2167 = vmatmul.mubr.msk.f32.gmra.mxu0 %vm63_vm1, %v50_v50  ;;  %2229 = vmatmul.mubr.msk.f32.gmra.mxu1 %vm63_vm1, %v444_v51  ;;  %v829_v50 = vld [vmem:[%s3526_s2 + $0x98] sm:$0xff] }
  0x38   :  { %2169 = vmatprep.mubr.msk.f32.mxu0 %vm63_vm1, %v51_v52  ;;  %2231 = vmatprep.mubr.msk.f32.mxu1 %vm63_vm1, %v445_v53  ;;  %v1218_v51 = vld [vmem:[%s3527_s3 + $0x98] sm:$0xff]  ;;  %v830_v52 = vld [vmem:[%s3526_s2 + $0xa0] sm:$0xff] }
  0x39   :  { %v1219_v53 = vld [vmem:[%s3527_s3 + $0xa0] sm:$0xff] }
  0x3b   :  { %2170 = vmatmul.mubr.msk.f32.gmra.mxu0 %vm63_vm1, %v52_v54  ;;  %2232 = vmatmul.mubr.msk.f32.gmra.mxu1 %vm63_vm1, %v446_v55  ;;  %v831_v54 = vld [vmem:[%s3526_s2 + $0xa8] sm:$0xff] }
  0x3c   :  { %2172 = vmatprep.mubr.msk.f32.mxu0 %vm63_vm1, %v53_v56  ;;  %2234 = vmatprep.mubr.msk.f32.mxu1 %vm63_vm1, %v447_v57  ;;  %v1220_v55 = vld [vmem:[%s3527_s3 + $0xa8] sm:$0xff]  ;;  %v832_v56 = vld [vmem:[%s3526_s2 + $0xb0] sm:$0xff] }
  0x3d   :  { %v1221_v57 = vld [vmem:[%s3527_s3 + $0xb0] sm:$0xff] }
  0x3f   :  { %2173 = vmatmul.mubr.msk.f32.gmra.mxu0 %vm63_vm1, %v54_v58  ;;  %2235 = vmatmul.mubr.msk.f32.gmra.mxu1 %vm63_vm1, %v448_v59  ;;  %v833_v58 = vld [vmem:[%s3526_s2 + $0xb8] sm:$0xff] }
  0x40   :  { %2175 = vmatprep.mubr.msk.f32.mxu0 %vm63_vm1, %v55_v60  ;;  %2237 = vmatprep.mubr.msk.f32.mxu1 %vm63_vm1, %v449_v61  ;;  %v1222_v59 = vld [vmem:[%s3527_s3 + $0xb8] sm:$0xff]  ;;  %v834_v60 = vld [vmem:[%s3526_s2 + $0xc0] sm:$0xff] }
  0x41   :  { %v1223_v61 = vld [vmem:[%s3527_s3 + $0xc0] sm:$0xff] }
  0x43   :  { %2176 = vmatmul.mubr.msk.f32.gmra.mxu0 %vm63_vm1, %v56_v62  ;;  %2238 = vmatmul.mubr.msk.f32.gmra.mxu1 %vm63_vm1, %v450_v63  ;;  %v835_v62 = vld [vmem:[%s3526_s2 + $0xc8] sm:$0xff] }
  0x44   :  { %2178 = vmatprep.mubr.msk.f32.mxu0 %vm63_vm1, %v57_v0  ;;  %2240 = vmatprep.mubr.msk.f32.mxu1 %vm63_vm1, %v451_v1  ;;  %v1224_v63 = vld [vmem:[%s3527_s3 + $0xc8] sm:$0xff]  ;;  %v836_v0 = vld [vmem:[%s3526_s2 + $0xd0] sm:$0xff] }
  0x45   :  { %v1225_v1 = vld [vmem:[%s3527_s3 + $0xd0] sm:$0xff] }
  0x47   :  { %2179 = vmatmul.mubr.msk.f32.gmra.mxu0 %vm63_vm1, %v58_v2  ;;  %2241 = vmatmul.mubr.msk.f32.gmra.mxu1 %vm63_vm1, %v452_v3  ;;  %v837_v2 = vld [vmem:[%s3526_s2 + $0xd8] sm:$0xff] }
  0x48   :  { %2181 = vmatprep.mubr.msk.f32.mxu0 %vm63_vm1, %v59_v4  ;;  %2243 = vmatprep.mubr.msk.f32.mxu1 %vm63_vm1, %v453_v5  ;;  %v1226_v3 = vld [vmem:[%s3527_s3 + $0xd8] sm:$0xff]  ;;  %v838_v4 = vld [vmem:[%s3526_s2 + $0xe0] sm:$0xff] }
  0x49   :  { %v1227_v5 = vld [vmem:[%s3527_s3 + $0xe0] sm:$0xff] }
  0x4b   :  { %2182 = vmatmul.mubr.msk.f32.gmra.mxu0 %vm63_vm1, %v60_v6  ;;  %2244 = vmatmul.mubr.msk.f32.gmra.mxu1 %vm63_vm1, %v454_v7  ;;  %v839_v6 = vld [vmem:[%s3526_s2 + $0xe8] sm:$0xff] }
  0x4c   :  { %2184 = vmatprep.mubr.msk.f32.mxu0 %vm63_vm1, %v61_v8  ;;  %2246 = vmatprep.mubr.msk.f32.mxu1 %vm63_vm1, %v455_v9  ;;  %v1228_v7 = vld [vmem:[%s3527_s3 + $0xe8] sm:$0xff]  ;;  %v840_v8 = vld [vmem:[%s3526_s2 + $0xf0] sm:$0xff] }
  0x4d   :  { %v1229_v9 = vld [vmem:[%s3527_s3 + $0xf0] sm:$0xff] }
  0x4f   :  { %2185 = vmatmul.mubr.msk.f32.gmra.mxu0 %vm63_vm1, %v62_v10  ;;  %2247 = vmatmul.mubr.msk.f32.gmra.mxu1 %vm63_vm1, %v456_v11  ;;  %v841_v10 = vld [vmem:[%s3526_s2 + $0xf8] sm:$0xff] }
  0x50   :  { %2257 = vmatprep.mubr.msk.f32.mxu0 %vm63_vm1, %v810_v12  ;;  %2319 = vmatprep.mubr.msk.f32.mxu1 %vm63_vm1, %v1199_v13  ;;  %v1230_v11 = vld [vmem:[%s3527_s3 + $0xf8] sm:$0xff]  ;;  %v842_v12 = vld [vmem:[%s3526_s2 + $0x100] sm:$0xff] }
  0x51   :  { %v1231_v13 = vld [vmem:[%s3527_s3 + $0x100] sm:$0xff] }
  0x53   :  { %2258 = vmatmul.mubr.msk.f32.vlgmr.msra.gmra.mxu0 %vm63_vm1, %v811_v14  ;;  %2320 = vmatmul.mubr.msk.f32.vlgmr.msra.gmra.mxu1 %vm63_vm1, %v1200_v15  ;;  %v843_v14 = vld [vmem:[%s3526_s2 + $0x108] sm:$0xff] }
  0x54   :  { %2260 = vmatprep.mubr.msk.f32.mxu0 %vm63_vm1, %v812_v16  ;;  %2322 = vmatprep.mubr.msk.f32.mxu1 %vm63_vm1, %v1201_v17  ;;  %v1232_v15 = vld [vmem:[%s3527_s3 + $0x108] sm:$0xff]  ;;  %v844_v16 = vld [vmem:[%s3526_s2 + $0x110] sm:$0xff] }
  0x55   :  { %v1233_v17 = vld [vmem:[%s3527_s3 + $0x110] sm:$0xff] }
  0x57   :  { %2261 = vmatmul.mubr.msk.f32.gmra.mxu0 %vm63_vm1, %v813_v18  ;;  %2323 = vmatmul.mubr.msk.f32.gmra.mxu1 %vm63_vm1, %v1202_v19  ;;  %v845_v18 = vld [vmem:[%s3526_s2 + $0x118] sm:$0xff] }
  0x58   :  { %2263 = vmatprep.mubr.msk.f32.mxu0 %vm63_vm1, %v814_v20  ;;  %2325 = vmatprep.mubr.msk.f32.mxu1 %vm63_vm1, %v1203_v21  ;;  %v1234_v19 = vld [vmem:[%s3527_s3 + $0x118] sm:$0xff] }
  0x5b   :  { %2264 = vmatmul.mubr.msk.f32.gmra.mxu0 %vm63_vm1, %v815_v22  ;;  %2326 = vmatmul.mubr.msk.f32.gmra.mxu1 %vm63_vm1, %v1204_v23 }
  0x5c   :  { %2266 = vmatprep.mubr.msk.f32.mxu0 %vm63_vm1, %v816_v24  ;;  %2328 = vmatprep.mubr.msk.f32.mxu1 %vm63_vm1, %v1205_v25 }
  0x5f   :  { %2267 = vmatmul.mubr.msk.f32.gmra.mxu0 %vm63_vm1, %v817_v26  ;;  %2329 = vmatmul.mubr.msk.f32.gmra.mxu1 %vm63_vm1, %v1206_v27 }
  0x60   :  { %2269 = vmatprep.mubr.msk.f32.mxu0 %vm63_vm1, %v818_v28  ;;  %2331 = vmatprep.mubr.msk.f32.mxu1 %vm63_vm1, %v1207_v29 }
  0x63   :  { %2270 = vmatmul.mubr.msk.f32.gmra.mxu0 %vm63_vm1, %v819_v30  ;;  %2332 = vmatmul.mubr.msk.f32.gmra.mxu1 %vm63_vm1, %v1208_v31 }
  0x64   :  { %2272 = vmatprep.mubr.msk.f32.mxu0 %vm63_vm1, %v820_v32  ;;  %2334 = vmatprep.mubr.msk.f32.mxu1 %vm63_vm1, %v1209_v33 }
  0x67   :  { %2273 = vmatmul.mubr.msk.f32.gmra.mxu0 %vm63_vm1, %v821_v34  ;;  %2335 = vmatmul.mubr.msk.f32.gmra.mxu1 %vm63_vm1, %v1210_v35 }
  0x68   :  { %2275 = vmatprep.mubr.msk.f32.mxu0 %vm63_vm1, %v822_v36  ;;  %2337 = vmatprep.mubr.msk.f32.mxu1 %vm63_vm1, %v1211_v37 }
  0x6b   :  { %2276 = vmatmul.mubr.msk.f32.gmra.mxu0 %vm63_vm1, %v823_v38  ;;  %2338 = vmatmul.mubr.msk.f32.gmra.mxu1 %vm63_vm1, %v1212_v39 }
  0x6c   :  { %2278 = vmatprep.mubr.msk.f32.mxu0 %vm63_vm1, %v824_v40  ;;  %2340 = vmatprep.mubr.msk.f32.mxu1 %vm63_vm1, %v1213_v41 }
  0x6f   :  { %2279 = vmatmul.mubr.msk.f32.gmra.mxu0 %vm63_vm1, %v825_v42  ;;  %2341 = vmatmul.mubr.msk.f32.gmra.mxu1 %vm63_vm1, %v1214_v43 }
  0x70   :  { %2281 = vmatprep.mubr.msk.f32.mxu0 %vm63_vm1, %v826_v44  ;;  %2343 = vmatprep.mubr.msk.f32.mxu1 %vm63_vm1, %v1215_v45 }
  0x73   :  { %2282 = vmatmul.mubr.msk.f32.gmra.mxu0 %vm63_vm1, %v827_v46  ;;  %2344 = vmatmul.mubr.msk.f32.gmra.mxu1 %vm63_vm1, %v1216_v47 }
  0x74   :  { %2284 = vmatprep.mubr.msk.f32.mxu0 %vm63_vm1, %v828_v48  ;;  %2346 = vmatprep.mubr.msk.f32.mxu1 %vm63_vm1, %v1217_v49 }
  0x77   :  { %2285 = vmatmul.mubr.msk.f32.gmra.mxu0 %vm63_vm1, %v829_v50  ;;  %2347 = vmatmul.mubr.msk.f32.gmra.mxu1 %vm63_vm1, %v1218_v51 }
  0x78   :  { %2287 = vmatprep.mubr.msk.f32.mxu0 %vm63_vm1, %v830_v52  ;;  %2349 = vmatprep.mubr.msk.f32.mxu1 %vm63_vm1, %v1219_v53 }
  0x7b   :  { %2288 = vmatmul.mubr.msk.f32.gmra.mxu0 %vm63_vm1, %v831_v54  ;;  %2350 = vmatmul.mubr.msk.f32.gmra.mxu1 %vm63_vm1, %v1220_v55 }
  0x7c   :  { %2290 = vmatprep.mubr.msk.f32.mxu0 %vm63_vm1, %v832_v56  ;;  %2352 = vmatprep.mubr.msk.f32.mxu1 %vm63_vm1, %v1221_v57 }
  0x7f   :  { %2291 = vmatmul.mubr.msk.f32.gmra.mxu0 %vm63_vm1, %v833_v58  ;;  %2353 = vmatmul.mubr.msk.f32.gmra.mxu1 %vm63_vm1, %v1222_v59 }
  0x80   :  { %2293 = vmatprep.mubr.msk.f32.mxu0 %vm63_vm1, %v834_v60  ;;  %2355 = vmatprep.mubr.msk.f32.mxu1 %vm63_vm1, %v1223_v61 }
  0x83   :  { %2294 = vmatmul.mubr.msk.f32.gmra.mxu0 %vm63_vm1, %v835_v62  ;;  %2356 = vmatmul.mubr.msk.f32.gmra.mxu1 %vm63_vm1, %v1224_v63 }
  0x84   :  { %2296 = vmatprep.mubr.msk.f32.mxu0 %vm63_vm1, %v836_v0  ;;  %2358 = vmatprep.mubr.msk.f32.mxu1 %vm63_vm1, %v1225_v1 }
  0x87   :  { %2297 = vmatmul.mubr.msk.f32.gmra.mxu0 %vm63_vm1, %v837_v2  ;;  %2359 = vmatmul.mubr.msk.f32.gmra.mxu1 %vm63_vm1, %v1226_v3 }
  0x88   :  { %2299 = vmatprep.mubr.msk.f32.mxu0 %vm63_vm1, %v838_v4  ;;  %2361 = vmatprep.mubr.msk.f32.mxu1 %vm63_vm1, %v1227_v5 }
  0x8b   :  { %2300 = vmatmul.mubr.msk.f32.gmra.mxu0 %vm63_vm1, %v839_v6  ;;  %2362 = vmatmul.mubr.msk.f32.gmra.mxu1 %vm63_vm1, %v1228_v7 }
  0x8c   :  { %2302 = vmatprep.mubr.msk.f32.mxu0 %vm63_vm1, %v840_v8  ;;  %2364 = vmatprep.mubr.msk.f32.mxu1 %vm63_vm1, %v1229_v9 }
  0x8f   :  { %2303 = vmatmul.mubr.msk.f32.gmra.mxu0 %vm63_vm1, %v841_v10  ;;  %2365 = vmatmul.mubr.msk.f32.gmra.mxu1 %vm63_vm1, %v1230_v11 }
  0x90   :  { %2305 = vmatprep.mubr.msk.f32.mxu0 %vm63_vm1, %v842_v12  ;;  %2367 = vmatprep.mubr.msk.f32.mxu1 %vm63_vm1, %v1231_v13  ;;  %v3233_v12 = vld [vmem:[%s3528_s5] ss:$0 sm:$0xff] }
  0x93   :  { %2306 = vmatmul.mubr.msk.f32.gmra.mxu0 %vm63_vm1, %v843_v14  ;;  %2368 = vmatmul.mubr.msk.f32.gmra.mxu1 %vm63_vm1, %v1232_v15 }
  0x94   :  { %2308 = vmatprep.mubr.msk.f32.mxu0 %vm63_vm1, %v844_v16  ;;  %2370 = vmatprep.mubr.msk.f32.mxu1 %vm63_vm1, %v1233_v17 }
  0x97   :  { %2309 = vmatmul.mubr.msk.f32.gmra.mxu0 %vm63_vm1, %v845_v18  ;;  %2371 = vmatmul.mubr.msk.f32.gmra.mxu1 %vm63_vm1, %v1234_v19 }
  0xcb   :  { %v3014_v20 = vpop.f32.mrf.mxu0  ;;  %v3016_v21 = vpop.f32.mrf.mxu1 }
  0xcc   :  { %v3580_v15 = vmax.f32 %v3014_v20, %v3016_v21 }
  0xcd   :  { %v3020_v23 = vpop.f32.mrf.mxu0  ;;  %v3022_v24 = vpop.f32.mrf.mxu1 }
  0xce   :  { %v3581_v18 = vmax.f32 %v3020_v23, %v3022_v24 }
  0xcf   :  { %v3026_v26 = vpop.f32.mrf.mxu0  ;;  %v3028_v27 = vpop.f32.mrf.mxu1 }
  0xd0   :  { %v3582_v20 = vmax.f32 %v3026_v26, %v3028_v27 }
  0xd1   :  { %v3032_v29 = vpop.f32.mrf.mxu0  ;;  %v3034_v30 = vpop.f32.mrf.mxu1 }
  0xd2   :  { %v3583_v24 = vmax.f32 %v3032_v29, %v3034_v30 }
  0xd3   :  { %v3038_v32 = vpop.f32.mrf.mxu0  ;;  %v3040_v33 = vpop.f32.mrf.mxu1 }
  0xd5   :  { %v3044_v35 = vpop.f32.mrf.mxu0  ;;  %v3046_v36 = vpop.f32.mrf.mxu1 }
  0xd7   :  { %v3050_v38 = vpop.f32.mrf.mxu0  ;;  %v3052_v39 = vpop.f32.mrf.mxu1 }
  0xd9   :  { %v3056_v41 = vpop.f32.mrf.mxu0  ;;  %v3058_v42 = vpop.f32.mrf.mxu1 }
  0xdb   :  { %v3062_v44 = vpop.f32.mrf.mxu0  ;;  %v3064_v45 = vpop.f32.mrf.mxu1 }
  0xdd   :  { %v3068_v47 = vpop.f32.mrf.mxu0  ;;  %v3070_v48 = vpop.f32.mrf.mxu1 }
  0xdf   :  { %v3074_v50 = vpop.f32.mrf.mxu0  ;;  %v3076_v51 = vpop.f32.mrf.mxu1 }
  0xe1   :  { %v3080_v53 = vpop.f32.mrf.mxu0  ;;  %v3082_v54 = vpop.f32.mrf.mxu1 }
  0xe3   :  { %v3086_v56 = vpop.f32.mrf.mxu0  ;;  %v3088_v57 = vpop.f32.mrf.mxu1 }
  0xe5   :  { %v3092_v59 = vpop.f32.mrf.mxu0  ;;  %v3094_v60 = vpop.f32.mrf.mxu1 }
  0xe7   :  { %v3098_v62 = vpop.f32.mrf.mxu0  ;;  %v3100_v63 = vpop.f32.mrf.mxu1 }
  0xe9   :  { %v3104_v1 = vpop.f32.mrf.mxu0  ;;  %v3106_v2 = vpop.f32.mrf.mxu1 }
  0xeb   :  { %v3110_v4 = vpop.f32.mrf.mxu0  ;;  %v3112_v5 = vpop.f32.mrf.mxu1 }
  0xed   :  { %v3116_v7 = vpop.f32.mrf.mxu0  ;;  %v3118_v8 = vpop.f32.mrf.mxu1 }
  0xef   :  { %v3122_v10 = vpop.f32.mrf.mxu0  ;;  %v3124_v11 = vpop.f32.mrf.mxu1 }
  0xf1   :  { %v3128_v13 = vpop.f32.mrf.mxu0  ;;  %v3130_v14 = vpop.f32.mrf.mxu1 }
  0xf3   :  { %v3134_v16 = vpop.f32.mrf.mxu0  ;;  %v3136_v17 = vpop.f32.mrf.mxu1 }
  0xf5   :  { %v3140_v19 = vpop.f32.mrf.mxu0  ;;  %v3142_v9 = vpop.f32.mrf.mxu1 }
  0xf7   :  { %v3146_v6 = vpop.f32.mrf.mxu0  ;;  %v3148_v3 = vpop.f32.mrf.mxu1 }
  0xf9   :  { %v3152_v0 = vpop.f32.mrf.mxu0  ;;  %v3154_v61 = vpop.f32.mrf.mxu1 }
  0xfa   :  { %3555 = vst [vmem:[#allocation2_spill] sm:$0xff] %v3154_v61 }
  0xfb   :  { %v3158_v58 = vpop.f32.mrf.mxu0  ;;  %v3160_v55 = vpop.f32.mrf.mxu1 }
  0xfc   :  { %3556 = vst [vmem:[#allocation3_spill] sm:$0xff] %v3158_v58  ;;  %3557 = vst [vmem:[#allocation4_spill] sm:$0xff] %v3160_v55 }
  0xfd   :  { %v3164_v52 = vpop.f32.mrf.mxu0  ;;  %v3166_v49 = vpop.f32.mrf.mxu1 }
  0xfe   :  { %3558 = vst [vmem:[#allocation5_spill] sm:$0xff] %v3164_v52  ;;  %3559 = vst [vmem:[#allocation6_spill] sm:$0xff] %v3166_v49 }
  0xff   :  { %v3170_v46 = vpop.f32.mrf.mxu0  ;;  %v3172_v43 = vpop.f32.mrf.mxu1 }
 0x100   :  { %3560 = vst [vmem:[#allocation7_spill] sm:$0xff] %v3170_v46  ;;  %3561 = vst [vmem:[#allocation8_spill] sm:$0xff] %v3172_v43 }
 0x101   :  { %v3176_v40 = vpop.f32.mrf.mxu0  ;;  %v3178_v37 = vpop.f32.mrf.mxu1 }
 0x102   :  { %3562 = vst [vmem:[#allocation9_spill] sm:$0xff] %v3176_v40  ;;  %3563 = vst [vmem:[#allocation10_spill] sm:$0xff] %v3178_v37 }
 0x103   :  { %v3182_v34 = vpop.f32.mrf.mxu0  ;;  %v3184_v31 = vpop.f32.mrf.mxu1 }
 0x104   :  { %3564 = vst [vmem:[#allocation11_spill] sm:$0xff] %v3182_v34  ;;  %3565 = vst [vmem:[#allocation12_spill] sm:$0xff] %v3184_v31 }
 0x105   :  { %v3188_v28 = vpop.f32.mrf.mxu0  ;;  %v3190_v25 = vpop.f32.mrf.mxu1 }
 0x106   :  { %3566 = vst [vmem:[#allocation13_spill] sm:$0xff] %v3188_v28  ;;  %3567 = vst [vmem:[#allocation14_spill] sm:$0xff] %v3190_v25 }
 0x107   :  { %v3194_v22 = vpop.f32.mrf.mxu0  ;;  %v3196_v43 = vpop.f32.mrf.mxu1 }
 0x108   :  { %3568 = vst [vmem:[#allocation15_spill] sm:$0xff] %v3194_v22  ;;  %3569 = vst [vmem:[#allocation16_spill] sm:$0xff] %v3196_v43 }
 0x109   :  { %v3200_v37 = vpop.f32.mrf.mxu0  ;;  %v3202_v40 = vpop.f32.mrf.mxu1 }
 0x10a   :  { %3570 = vst [vmem:[#allocation17_spill] sm:$0xff] %v3200_v37  ;;  %3571 = vst [vmem:[#allocation18_spill] sm:$0xff] %v3202_v40 }
 0x10b   :  { %v3206_v31 = vpop.f32.mrf.mxu0  ;;  %v3208_v34 = vpop.f32.mrf.mxu1 }
 0x10c   :  { %3572 = vst [vmem:[#allocation19_spill] sm:$0xff] %v3206_v31  ;;  %3573 = vst [vmem:[#allocation20_spill] sm:$0xff] %v3208_v34 }
 0x10d   :  { %v3212_v25 = vpop.f32.mrf.mxu0  ;;  %v3214_v28 = vpop.f32.mrf.mxu1 }
 0x10e   :  { %3574 = vst [vmem:[#allocation21_spill] sm:$0xff] %v3212_v25  ;;  %3575 = vst [vmem:[#allocation22_spill] sm:$0xff] %v3214_v28 }
 0x10f   :  { %v3218_v43 = vpop.f32.mrf.mxu0  ;;  %v3220_v22 = vpop.f32.mrf.mxu1 }
 0x110   :  { %3576 = vst [vmem:[#allocation23_spill] sm:$0xff] %v3218_v43  ;;  %3577 = vst [vmem:[#allocation24_spill] sm:$0xff] %v3220_v22 }
 0x111   :  { %v3224_v40 = vpop.f32.mrf.mxu0  ;;  %v3226_v37 = vpop.f32.mrf.mxu1 }
 0x112   :  { %3578 = vst [vmem:[#allocation25_spill] sm:$0xff] %v3224_v40  ;;  %3579 = vst [vmem:[#allocation26_spill] sm:$0xff] %v3226_v37 }
 0x113   :  { %v2259_v34 = vpop.f32.mrf.mxu0  ;;  %v2321_v31 = vpop.f32.mrf.mxu1 }
 0x114   :  { %v1625_v46 = vmax.f32 %v2259_v34, %v2321_v31 }
 0x115   :  { %v1020_v28 = vpop.f32.mrf.mxu0  ;;  %v1409_v25 = vpop.f32.mrf.mxu1 }
 0x116   :  { %v1661_v22 = vmax.f32 %v3580_v15, %v1625_v46  ;;  %v1624_v43 = vmax.f32 %v1020_v28, %v1409_v25 }
 0x117   :  { %v2262_v49 = vpop.f32.mrf.mxu0  ;;  %v2324_v52 = vpop.f32.mrf.mxu1 }
 0x118   :  { %v1704_v55 = vadd.f32 %v3233_v12, %v1661_v22  ;;  %v1660_v31 = vmax.f32 %v3581_v18, %v1624_v43  ;;  %v1627_v34 = vmax.f32 %v2262_v49, %v2324_v52  ;;  %v3585_v18 = vmax.f32 %v3044_v35, %v3046_v36 }
 0x119   :  { %v1030_v37 = vpop.f32.mrf.mxu0  ;;  %v1419_v40 = vpop.f32.mrf.mxu1 }
 0x11a   :  { %v1740_v58 = vmax.f32 %v1704_v55, 0.0  ;;  %v1703_v61 = vadd.f32 %v3233_v12, %v1660_v31  ;;  %v1663_v21 = vmax.f32 %v3582_v20, %v1627_v34  ;;  %v1626_v25 = vmax.f32 %v1030_v37, %v1419_v40 }
 0x11b   :  { %v2265_v28 = vpop.f32.mrf.mxu0  ;;  %v2327_v46 = vpop.f32.mrf.mxu1  ;;  %v3584_v37 = vmax.f32 %v3038_v32, %v3040_v33 }
 0x11c   :  { %1777 = vst.msk [vmem:[%s3529_s6 + $0x8] sm:$0xff] %vm1775_vm2, %v1740_v58  ;;  %v1739_v22 = vmax.f32 %v1703_v61, 0.0  ;;  %v1706_v23 = vadd.f32 %v3233_v12, %v1663_v21  ;;  %v1662_v43 = vmax.f32 %v3583_v24, %v1626_v25  ;;  %v1629_v49 = vmax.f32 %v2265_v28, %v2327_v46 }
 0x11d   :  { %v1040_v52 = vpop.f32.mrf.mxu0  ;;  %v1429_v55 = vpop.f32.mrf.mxu1  ;;  %v3586_v25 = vmax.f32 %v3050_v38, %v3052_v39  ;;  %v3587_v24 = vmax.f32 %v3056_v41, %v3058_v42 }
 0x11e   :  { %1776 = vst.msk [vmem:[%s3529_s6] sm:$0xff] %vm1775_vm2, %v1739_v22  ;;  %v1742_v26 = vmax.f32 %v1706_v23, 0.0  ;;  %v1705_v27 = vadd.f32 %v3233_v12, %v1662_v43  ;;  %v1665_v40 = vmax.f32 %v3584_v37, %v1629_v49  ;;  %v1628_v58 = vmax.f32 %v1040_v52, %v1429_v55 }
 0x11f   :  { %v2268_v61 = vpop.f32.mrf.mxu0  ;;  %v2330_v15 = vpop.f32.mrf.mxu1 }
 0x120   :  { %1779 = vst.msk [vmem:[%s3529_s6 + $0x18] sm:$0xff] %vm1775_vm2, %v1742_v26  ;;  %v1741_v29 = vmax.f32 %v1705_v27, 0.0  ;;  %v1708_v30 = vadd.f32 %v3233_v12, %v1665_v40  ;;  %v1664_v31 = vmax.f32 %v3585_v18, %v1628_v58  ;;  %v1631_v34 = vmax.f32 %v2268_v61, %v2330_v15 }
 0x121   :  { %v1050_v20 = vpop.f32.mrf.mxu0  ;;  %v1439_v21 = vpop.f32.mrf.mxu1  ;;  %v3588_v26 = vmax.f32 %v3062_v44, %v3064_v45  ;;  %v3589_v61 = vmax.f32 %v3068_v47, %v3070_v48 }
 0x122   :  { %1778 = vst.msk [vmem:[%s3529_s6 + $0x10] sm:$0xff] %vm1775_vm2, %v1741_v29  ;;  %v1744_v32 = vmax.f32 %v1708_v30, 0.0  ;;  %v1707_v33 = vadd.f32 %v3233_v12, %v1664_v31  ;;  %v1667_v28 = vmax.f32 %v3586_v25, %v1631_v34  ;;  %v1630_v46 = vmax.f32 %v1050_v20, %v1439_v21 }
 0x123   :  { %v2271_v22 = vpop.f32.mrf.mxu0  ;;  %v2333_v23 = vpop.f32.mrf.mxu1  ;;  %v3590_v31 = vmax.f32 %v3074_v50, %v3076_v51 }
 0x124   :  { %1781 = vst.msk [vmem:[%s3529_s6 + $0x28] sm:$0xff] %vm1775_vm2, %v1744_v32  ;;  %v1743_v35 = vmax.f32 %v1707_v33, 0.0  ;;  %v1710_v36 = vadd.f32 %v3233_v12, %v1667_v28  ;;  %v1666_v43 = vmax.f32 %v3587_v24, %v1630_v46  ;;  %v1633_v49 = vmax.f32 %v2271_v22, %v2333_v23 }
 0x125   :  { %v1060_v52 = vpop.f32.mrf.mxu0  ;;  %v1449_v55 = vpop.f32.mrf.mxu1  ;;  %v3591_v33 = vmax.f32 %v3080_v53, %v3082_v54  ;;  %v3592_v23 = vmax.f32 %v3086_v56, %v3088_v57 }
 0x126   :  { %1780 = vst.msk [vmem:[%s3529_s6 + $0x20] sm:$0xff] %vm1775_vm2, %v1743_v35  ;;  %v1746_v38 = vmax.f32 %v1710_v36, 0.0  ;;  %v1709_v39 = vadd.f32 %v3233_v12, %v1666_v43  ;;  %v1669_v27 = vmax.f32 %v3588_v26, %v1633_v49  ;;  %v1632_v37 = vmax.f32 %v1060_v52, %v1449_v55 }
 0x127   :  { %v2274_v40 = vpop.f32.mrf.mxu0  ;;  %v2336_v58 = vpop.f32.mrf.mxu1  ;;  %v3593_v49 = vmax.f32 %v3092_v59, %v3094_v60  ;;  %v3594_v26 = vmax.f32 %v3098_v62, %v3100_v63 }
 0x128   :  { %1783 = vst.msk [vmem:[%s3529_s6 + $0x38] sm:$0xff] %vm1775_vm2, %v1746_v38  ;;  %v1745_v41 = vmax.f32 %v1709_v39, 0.0  ;;  %v1712_v42 = vadd.f32 %v3233_v12, %v1669_v27  ;;  %v1668_v15 = vmax.f32 %v3589_v61, %v1632_v37  ;;  %v1635_v29 = vmax.f32 %v2274_v40, %v2336_v58 }
 0x129   :  { %v1070_v30 = vpop.f32.mrf.mxu0  ;;  %v1459_v18 = vpop.f32.mrf.mxu1 }
 0x12a   :  { %1782 = vst.msk [vmem:[%s3529_s6 + $0x30] sm:$0xff] %vm1775_vm2, %v1745_v41  ;;  %v1748_v44 = vmax.f32 %v1712_v42, 0.0  ;;  %v1711_v45 = vadd.f32 %v3233_v12, %v1668_v15  ;;  %v1671_v34 = vmax.f32 %v3590_v31, %v1635_v29  ;;  %v1634_v20 = vmax.f32 %v1070_v30, %v1459_v18 }
 0x12b   :  { %v2277_v21 = vpop.f32.mrf.mxu0  ;;  %v2339_v32 = vpop.f32.mrf.mxu1  ;;  %v3595_v41 = vmax.f32 %v3104_v1, %v3106_v2  ;;  %v3596_v30 = vmax.f32 %v3110_v4, %v3112_v5 }
 0x12c   :  { %1785 = vst.msk [vmem:[%s3529_s6 + $0x48] sm:$0xff] %vm1775_vm2, %v1748_v44  ;;  %v1747_v47 = vmax.f32 %v1711_v45, 0.0  ;;  %v1714_v48 = vadd.f32 %v3233_v12, %v1671_v34  ;;  %v1670_v25 = vmax.f32 %v3591_v33, %v1634_v20  ;;  %v1637_v28 = vmax.f32 %v2277_v21, %v2339_v32 }
 0x12d   :  { %v1080_v46 = vpop.f32.mrf.mxu0  ;;  %v1469_v22 = vpop.f32.mrf.mxu1  ;;  %v3597_v34 = vmax.f32 %v3116_v7, %v3118_v8 }
 0x12e   :  { %1784 = vst.msk [vmem:[%s3529_s6 + $0x40] sm:$0xff] %vm1775_vm2, %v1747_v47  ;;  %v1750_v50 = vmax.f32 %v1714_v48, 0.0  ;;  %v1713_v51 = vadd.f32 %v3233_v12, %v1670_v25  ;;  %v1673_v35 = vmax.f32 %v3592_v23, %v1637_v28  ;;  %v1636_v36 = vmax.f32 %v1080_v46, %v1469_v22 }
 0x12f   :  { %v2280_v24 = vpop.f32.mrf.mxu0  ;;  %v2342_v43 = vpop.f32.mrf.mxu1  ;;  %v3598_v48 = vmax.f32 %v3122_v10, %v3124_v11  ;;  %v3599_v22 = vmax.f32 %v3128_v13, %v3130_v14 }
 0x130   :  { %1787 = vst.msk [vmem:[%s3529_s6 + $0x58] sm:$0xff] %vm1775_vm2, %v1750_v50  ;;  %v1749_v53 = vmax.f32 %v1713_v51, 0.0  ;;  %v1716_v54 = vadd.f32 %v3233_v12, %v1673_v35  ;;  %v1672_v52 = vmax.f32 %v3593_v49, %v1636_v36  ;;  %v1639_v55 = vmax.f32 %v2280_v24, %v2342_v43 }
 0x131   :  { %v1090_v38 = vpop.f32.mrf.mxu0  ;;  %v1479_v39 = vpop.f32.mrf.mxu1  ;;  %v3600_v36 = vmax.f32 %v3134_v16, %v3136_v17  ;;  %v3601_v49 = vmax.f32 %v3140_v19, %v3142_v9 }
 0x132   :  { %1786 = vst.msk [vmem:[%s3529_s6 + $0x50] sm:$0xff] %vm1775_vm2, %v1749_v53  ;;  %v1752_v56 = vmax.f32 %v1716_v54, 0.0  ;;  %v1715_v57 = vadd.f32 %v3233_v12, %v1672_v52  ;;  %v1675_v27 = vmax.f32 %v3594_v26, %v1639_v55  ;;  %v1638_v37 = vmax.f32 %v1090_v38, %v1479_v39 }
 0x133   :  { %v2283_v40 = vpop.f32.mrf.mxu0  ;;  %v2345_v58 = vpop.f32.mrf.mxu1 }
 0x134   :  { %1789 = vst.msk [vmem:[%s3529_s6 + $0x68] sm:$0xff] %vm1775_vm2, %v1752_v56  ;;  %v1751_v59 = vmax.f32 %v1715_v57, 0.0  ;;  %v1718_v60 = vadd.f32 %v3233_v12, %v1675_v27  ;;  %v1674_v42 = vmax.f32 %v3595_v41, %v1638_v37  ;;  %v1641_v61 = vmax.f32 %v2283_v40, %v2345_v58  ;;  %v3603_v40 = vld [vmem:[#allocation2_spill] sm:$0xff] }
 0x135   :  { %v1100_v15 = vpop.f32.mrf.mxu0  ;;  %v1489_v29 = vpop.f32.mrf.mxu1  ;;  %v3602_v56 = vmax.f32 %v3146_v6, %v3148_v3  ;;  %v3604_v58 = vmax.f32 %v3152_v0, %v3603_v40  ;;  %v3624_v40 = vld [vmem:[#allocation16_spill] sm:$0xff] }
 0x136   :  { %1788 = vst.msk [vmem:[%s3529_s6 + $0x60] sm:$0xff] %vm1775_vm2, %v1751_v59  ;;  %v1754_v62 = vmax.f32 %v1718_v60, 0.0  ;;  %v1717_v63 = vadd.f32 %v3233_v12, %v1674_v42  ;;  %v1677_v18 = vmax.f32 %v3596_v30, %v1641_v61  ;;  %v1640_v44 = vmax.f32 %v1100_v15, %v1489_v29  ;;  %v3605_v61 = vld [vmem:[#allocation3_spill] sm:$0xff]  ;;  %v3606_v15 = vld [vmem:[#allocation4_spill] sm:$0xff] }
 0x137   :  { %v2286_v45 = vpop.f32.mrf.mxu0  ;;  %v2348_v31 = vpop.f32.mrf.mxu1  ;;  %v3607_v29 = vmax.f32 %v3605_v61, %v3606_v15  ;;  %v3626_v61 = vld [vmem:[#allocation17_spill] sm:$0xff]  ;;  %v3627_v15 = vld [vmem:[#allocation18_spill] sm:$0xff] }
 0x138   :  { %1791 = vst.msk [vmem:[%s3529_s6 + $0x78] sm:$0xff] %vm1775_vm2, %v1754_v62  ;;  %v1753_v1 = vmax.f32 %v1717_v63, 0.0  ;;  %v1720_v2 = vadd.f32 %v3233_v12, %v1677_v18  ;;  %v1676_v20 = vmax.f32 %v3597_v34, %v1640_v44  ;;  %v1643_v21 = vmax.f32 %v2286_v45, %v2348_v31  ;;  %v3608_v45 = vld [vmem:[#allocation5_spill] sm:$0xff]  ;;  %v3609_v31 = vld [vmem:[#allocation6_spill] sm:$0xff] }
 0x139   :  { %v1110_v32 = vpop.f32.mrf.mxu0  ;;  %v1499_v47 = vpop.f32.mrf.mxu1 }
 0x13a   :  { %1790 = vst.msk [vmem:[%s3529_s6 + $0x70] sm:$0xff] %vm1775_vm2, %v1753_v1  ;;  %v1756_v4 = vmax.f32 %v1720_v2, 0.0  ;;  %v1719_v5 = vadd.f32 %v3233_v12, %v1676_v20  ;;  %v1679_v33 = vmax.f32 %v3598_v48, %v1643_v21  ;;  %v1642_v25 = vmax.f32 %v1110_v32, %v1499_v47 }
 0x13b   :  { %v2289_v28 = vpop.f32.mrf.mxu0  ;;  %v2351_v46 = vpop.f32.mrf.mxu1  ;;  %v3610_v1 = vmax.f32 %v3608_v45, %v3609_v31  ;;  %v3629_v45 = vld [vmem:[#allocation19_spill] sm:$0xff]  ;;  %v3630_v31 = vld [vmem:[#allocation20_spill] sm:$0xff] }
 0x13c   :  { %1793 = vst.msk [vmem:[%s3529_s6 + $0x88] sm:$0xff] %vm1775_vm2, %v1756_v4  ;;  %v1755_v7 = vmax.f32 %v1719_v5, 0.0  ;;  %v1722_v8 = vadd.f32 %v3233_v12, %v1679_v33  ;;  %v1678_v50 = vmax.f32 %v3599_v22, %v1642_v25  ;;  %v1645_v51 = vmax.f32 %v2289_v28, %v2351_v46  ;;  %v3611_v4 = vld [vmem:[#allocation7_spill] sm:$0xff]  ;;  %v3612_v5 = vld [vmem:[#allocation8_spill] sm:$0xff]  ;;  %v3614_v22 = vld [vmem:[#allocation9_spill] sm:$0xff] }
 0x13d   :  { %v1120_v23 = vpop.f32.mrf.mxu0  ;;  %v1509_v35 = vpop.f32.mrf.mxu1  ;;  %v3613_v48 = vmax.f32 %v3611_v4, %v3612_v5  ;;  %v3632_v4 = vld [vmem:[#allocation21_spill] sm:$0xff]  ;;  %v3633_v5 = vld [vmem:[#allocation22_spill] sm:$0xff] }
 0x13e   :  { %1792 = vst.msk [vmem:[%s3529_s6 + $0x80] sm:$0xff] %vm1775_vm2, %v1755_v7  ;;  %v1758_v10 = vmax.f32 %v1722_v8, 0.0  ;;  %v1721_v11 = vadd.f32 %v3233_v12, %v1678_v50  ;;  %v1681_v24 = vmax.f32 %v3600_v36, %v1645_v51  ;;  %v1644_v43 = vmax.f32 %v1120_v23, %v1509_v35  ;;  %v3615_v50 = vld [vmem:[#allocation10_spill] sm:$0xff] }
 0x13f   :  { %v2292_v53 = vpop.f32.mrf.mxu0  ;;  %v2354_v54 = vpop.f32.mrf.mxu1  ;;  %v3616_v51 = vmax.f32 %v3614_v22, %v3615_v50  ;;  %v3635_v22 = vld [vmem:[#allocation23_spill] sm:$0xff]  ;;  %v3636_v50 = vld [vmem:[#allocation24_spill] sm:$0xff] }
 0x140   :  { %1795 = vst.msk [vmem:[%s3529_s6 + $0x98] sm:$0xff] %vm1775_vm2, %v1758_v10  ;;  %v1757_v13 = vmax.f32 %v1721_v11, 0.0  ;;  %v1724_v14 = vadd.f32 %v3233_v12, %v1681_v24  ;;  %v1680_v52 = vmax.f32 %v3601_v49, %v1644_v43  ;;  %v1647_v55 = vmax.f32 %v2292_v53, %v2354_v54  ;;  %v3617_v43 = vld [vmem:[#allocation11_spill] sm:$0xff]  ;;  %v3618_v53 = vld [vmem:[#allocation12_spill] sm:$0xff] }
 0x141   :  { %v1130_v38 = vpop.f32.mrf.mxu0  ;;  %v1519_v39 = vpop.f32.mrf.mxu1  ;;  %v3619_v54 = vmax.f32 %v3617_v43, %v3618_v53 }
 0x142   :  { %1794 = vst.msk [vmem:[%s3529_s6 + $0x90] sm:$0xff] %vm1775_vm2, %v1757_v13  ;;  %v1760_v16 = vmax.f32 %v1724_v14, 0.0  ;;  %v1723_v17 = vadd.f32 %v3233_v12, %v1680_v52  ;;  %v1683_v57 = vmax.f32 %v3602_v56, %v1647_v55  ;;  %v1646_v26 = vmax.f32 %v1130_v38, %v1519_v39  ;;  %v3620_v39 = vld [vmem:[#allocation13_spill] sm:$0xff] }
 0x143   :  { %v2295_v27 = vpop.f32.mrf.mxu0  ;;  %v2357_v37 = vpop.f32.mrf.mxu1 }
 0x144   :  { %1797 = vst.msk [vmem:[%s3529_s6 + $0xa8] sm:$0xff] %vm1775_vm2, %v1760_v16  ;;  %v1759_v9 = vmax.f32 %v1723_v17, 0.0  ;;  %v1726_v19 = vadd.f32 %v3233_v12, %v1683_v57  ;;  %v1682_v59 = vmax.f32 %v3604_v58, %v1646_v26  ;;  %v1649_v60 = vmax.f32 %v2295_v27, %v2357_v37  ;;  %v3621_v16 = vld [vmem:[#allocation14_spill] sm:$0xff] }
 0x145   :  { %v1140_v41 = vpop.f32.mrf.mxu0  ;;  %v1529_v42 = vpop.f32.mrf.mxu1  ;;  %v3622_v17 = vmax.f32 %v3620_v39, %v3621_v16 }
 0x146   :  { %1796 = vst.msk [vmem:[%s3529_s6 + $0xa0] sm:$0xff] %vm1775_vm2, %v1759_v9  ;;  %v1762_v3 = vmax.f32 %v1726_v19, 0.0  ;;  %v1725_v6 = vadd.f32 %v3233_v12, %v1682_v59  ;;  %v1685_v62 = vmax.f32 %v3607_v29, %v1649_v60  ;;  %v1648_v63 = vmax.f32 %v1140_v41, %v1529_v42  ;;  %v3623_v19 = vld [vmem:[#allocation15_spill] sm:$0xff] }
 0x147   :  { %v2298_v30 = vpop.f32.mrf.mxu0  ;;  %v2360_v18 = vpop.f32.mrf.mxu1  ;;  %v3625_v58 = vmax.f32 %v3623_v19, %v3624_v40  ;;  %v3628_v29 = vmax.f32 %v3626_v61, %v3627_v15 }
 0x148   :  { %1799 = vst.msk [vmem:[%s3529_s6 + $0xb8] sm:$0xff] %vm1775_vm2, %v1762_v3  ;;  %v1761_v0 = vmax.f32 %v1725_v6, 0.0  ;;  %v1728_v44 = vadd.f32 %v3233_v12, %v1685_v62  ;;  %v1684_v2 = vmax.f32 %v3610_v1, %v1648_v63  ;;  %v1651_v34 = vmax.f32 %v2298_v30, %v2360_v18 }
 0x149   :  { %v1150_v20 = vpop.f32.mrf.mxu0  ;;  %v1539_v21 = vpop.f32.mrf.mxu1  ;;  %v3631_v1 = vmax.f32 %v3629_v45, %v3630_v31 }
 0x14a   :  { %1798 = vst.msk [vmem:[%s3529_s6 + $0xb0] sm:$0xff] %vm1775_vm2, %v1761_v0  ;;  %v1764_v32 = vmax.f32 %v1728_v44, 0.0  ;;  %v1727_v47 = vadd.f32 %v3233_v12, %v1684_v2  ;;  %v1687_v33 = vmax.f32 %v3613_v48, %v1651_v34  ;;  %v1650_v25 = vmax.f32 %v1150_v20, %v1539_v21 }
 0x14b   :  { %v2301_v28 = vpop.f32.mrf.mxu0  ;;  %v2363_v46 = vpop.f32.mrf.mxu1  ;;  %v3634_v48 = vmax.f32 %v3632_v4, %v3633_v5 }
 0x14c   :  { %1801 = vst.msk [vmem:[%s3529_s6 + $0xc8] sm:$0xff] %vm1775_vm2, %v1764_v32  ;;  %v1763_v7 = vmax.f32 %v1727_v47, 0.0  ;;  %v1730_v8 = vadd.f32 %v3233_v12, %v1687_v33  ;;  %v1686_v23 = vmax.f32 %v3616_v51, %v1650_v25  ;;  %v1653_v35 = vmax.f32 %v2301_v28, %v2363_v46 }
 0x14d   :  { %v1160_v10 = vpop.f32.mrf.mxu0  ;;  %v1549_v11 = vpop.f32.mrf.mxu1  ;;  %v3637_v51 = vmax.f32 %v3635_v22, %v3636_v50 }
 0x14e   :  { %1800 = vst.msk [vmem:[%s3529_s6 + $0xc0] sm:$0xff] %vm1775_vm2, %v1763_v7  ;;  %v1766_v36 = vmax.f32 %v1730_v8, 0.0  ;;  %v1729_v24 = vadd.f32 %v3233_v12, %v1686_v23  ;;  %v1689_v13 = vmax.f32 %v3619_v54, %v1653_v35  ;;  %v1652_v14 = vmax.f32 %v1160_v10, %v1549_v11 }
 0x14f   :  { %v2304_v49 = vpop.f32.mrf.mxu0  ;;  %v2366_v52 = vpop.f32.mrf.mxu1 }
 0x150   :  { %1803 = vst.msk [vmem:[%s3529_s6 + $0xd8] sm:$0xff] %vm1775_vm2, %v1766_v36  ;;  %v1765_v55 = vmax.f32 %v1729_v24, 0.0  ;;  %v1732_v38 = vadd.f32 %v3233_v12, %v1689_v13  ;;  %v1688_v56 = vmax.f32 %v3622_v17, %v1652_v14  ;;  %v1655_v57 = vmax.f32 %v2304_v49, %v2366_v52  ;;  %v3638_v36 = vld [vmem:[#allocation25_spill] sm:$0xff]  ;;  %v3639_v24 = vld [vmem:[#allocation26_spill] sm:$0xff] }
 0x151   :  { %v1170_v26 = vpop.f32.mrf.mxu0  ;;  %v1559_v27 = vpop.f32.mrf.mxu1  ;;  %v3640_v43 = vmax.f32 %v3638_v36, %v3639_v24 }
 0x152   :  { %1802 = vst.msk [vmem:[%s3529_s6 + $0xd0] sm:$0xff] %vm1775_vm2, %v1765_v55  ;;  %v1768_v37 = vmax.f32 %v1732_v38, 0.0  ;;  %v1731_v9 = vadd.f32 %v3233_v12, %v1688_v56  ;;  %v1691_v59 = vmax.f32 %v3625_v58, %v1655_v57  ;;  %v1654_v60 = vmax.f32 %v1170_v26, %v1559_v27 }
 0x153   :  { %v2307_v41 = vpop.f32.mrf.mxu0  ;;  %v2369_v42 = vpop.f32.mrf.mxu1 }
 0x154   :  { %1805 = vst.msk [vmem:[%s3529_s6 + $0xe8] sm:$0xff] %vm1775_vm2, %v1768_v37  ;;  %v1767_v3 = vmax.f32 %v1731_v9, 0.0  ;;  %v1734_v6 = vadd.f32 %v3233_v12, %v1691_v59  ;;  %v1690_v62 = vmax.f32 %v3628_v29, %v1654_v60  ;;  %v1657_v63 = vmax.f32 %v2307_v41, %v2369_v42 }
 0x155   :  { %v1180_v30 = vpop.f32.mrf.mxu0  ;;  %v1569_v18 = vpop.f32.mrf.mxu1 }
 0x156   :  { %1804 = vst.msk [vmem:[%s3529_s6 + $0xe0] sm:$0xff] %vm1775_vm2, %v1767_v3  ;;  %v1770_v0 = vmax.f32 %v1734_v6, 0.0  ;;  %v1733_v44 = vadd.f32 %v3233_v12, %v1690_v62  ;;  %v1693_v2 = vmax.f32 %v3631_v1, %v1657_v63  ;;  %v1656_v34 = vmax.f32 %v1180_v30, %v1569_v18 }
 0x157   :  { %v2310_v20 = vpop.f32.mrf.mxu0  ;;  %v2372_v21 = vpop.f32.mrf.mxu1 }
 0x158   :  { %1807 = vst.msk [vmem:[%s3529_s6 + $0xf8] sm:$0xff] %vm1775_vm2, %v1770_v0  ;;  %v1769_v32 = vmax.f32 %v1733_v44, 0.0  ;;  %v1736_v47 = vadd.f32 %v3233_v12, %v1693_v2  ;;  %v1692_v33 = vmax.f32 %v3634_v48, %v1656_v34  ;;  %v1659_v25 = vmax.f32 %v2310_v20, %v2372_v21 }
 0x159   :  { %v1190_v28 = vpop.f32.mrf.mxu0  ;;  %v1579_v46 = vpop.f32.mrf.mxu1 }
 0x15a   :  { %1806 = vst.msk [vmem:[%s3529_s6 + $0xf0] sm:$0xff] %vm1775_vm2, %v1769_v32  ;;  %v1772_v7 = vmax.f32 %v1736_v47, 0.0  ;;  %v1735_v8 = vadd.f32 %v3233_v12, %v1692_v33  ;;  %v1695_v23 = vmax.f32 %v3637_v51, %v1659_v25  ;;  %v1658_v35 = vmax.f32 %v1190_v28, %v1579_v46 }
 0x15c   :  { %1809 = vst.msk [vmem:[%s3529_s6 + $0x108] sm:$0xff] %vm1775_vm2, %v1772_v7  ;;  %v1771_v10 = vmax.f32 %v1735_v8, 0.0  ;;  %v1738_v11 = vadd.f32 %v3233_v12, %v1695_v23  ;;  %v1694_v53 = vmax.f32 %v3640_v43, %v1658_v35 }
 0x15e   :  { %1808 = vst.msk [vmem:[%s3529_s6 + $0x100] sm:$0xff] %vm1775_vm2, %v1771_v10  ;;  %v1774_v54 = vmax.f32 %v1738_v11, 0.0  ;;  %v1737_v13 = vadd.f32 %v3233_v12, %v1694_v53 }
 0x160   :  { %1811 = vst.msk [vmem:[%s3529_s6 + $0x118] sm:$0xff] %vm1775_vm2, %v1774_v54  ;;  %v1773_v14 = vmax.f32 %v1737_v13, 0.0 }
 0x162   :  { %1810 = vst.msk [vmem:[%s3529_s6 + $0x110] sm:$0xff] %vm1775_vm2, %v1773_v14 }

// kernel: forward.4
= control target key start
LH: loop header
LB: loop body
LE: loop exit
PB: predicated region body
PF: predicated region fallthrough
CT: control target
= control target key end

     0   :  { %vm76_vm0 = vcmask 1041408   ;;  %vm63_vm1 = vcmask 998400   ;;  %vm507_vm2 = vcmask 162816   ;;  %s1171_s4 = inlined_call_operand.vmem [shape: f32[250,20], index: 4, kind: input, shape index: {}]   ;;  %s1172_s0 = inlined_call_operand.vmem [shape: f32[32,250], index: 0, kind: input, shape index: {}]   ;;  %s1173_s1 = inlined_call_operand.vmem [shape: f32[32,250], index: 1, kind: input, shape index: {}]   ;;  %s1174_s2 = inlined_call_operand.vmem [shape: f32[32,250], index: 2, kind: input, shape index: {}]   ;;  %s1175_s3 = inlined_call_operand.vmem [shape: f32[32,250], index: 3, kind: input, shape index: {}]   ;;  %s1176_s5 = inlined_call_operand.vmem [shape: f32[1,20], index: 5, kind: input, shape index: {}]   ;;  %s1177_s6 = inlined_call_operand.vmem [shape: f32[32,20], index: 6, kind: output, shape index: {}]  }
   0x1   :  { %v751_v0 = vld [vmem:[%s1171_s4 + $0xf8] sm:$0x3]  ;;  %v761_v2 = vld [vmem:[%s1171_s4 + $0xf0] sm:$0xff]  ;;  %v777_v4 = vld [vmem:[%s1171_s4 + $0xe8] sm:$0xff] }
   0x2   :  { %v756_v1 = vld [vmem:[%s1171_s4 + $0x78] sm:$0xff]  ;;  %537 = vmatprep.subr.msk.mxu0 %vm76_vm0, %v751_v0  ;;  %581 = vmatprep.subr.msk.mxu1 %vm76_vm0, %v751_v0  ;;  %v770_v3 = vld [vmem:[%s1171_s4 + $0x70] sm:$0xff]  ;;  %v784_v5 = vld [vmem:[%s1171_s4 + $0x68] sm:$0xff] }
   0x3   :  { %538 = vmatpush3.msra.mxu0 %v756_v1  ;;  %582 = vmatpush3.msra.mxu1 %v756_v1  ;;  %v791_v6 = vld [vmem:[%s1171_s4 + $0xe0] sm:$0xff]  ;;  %v805_v8 = vld [vmem:[%s1171_s4 + $0xd8] sm:$0xff]  ;;  %v819_v10 = vld [vmem:[%s1171_s4 + $0xd0] sm:$0xff] }
   0x4   :  { %539 = vmatprep.subr.mxu0 %v761_v2  ;;  %583 = vmatprep.subr.mxu1 %v761_v2  ;;  %v798_v7 = vld [vmem:[%s1171_s4 + $0x60] sm:$0xff]  ;;  %v812_v9 = vld [vmem:[%s1171_s4 + $0x58] sm:$0xff]  ;;  %v826_v11 = vld [vmem:[%s1171_s4 + $0x50] sm:$0xff] }
   0x5   :  { %540 = vmatpush3.msra.mxu0 %v770_v3  ;;  %584 = vmatpush3.msra.mxu1 %v770_v3  ;;  %v833_v12 = vld [vmem:[%s1171_s4 + $0xc8] sm:$0xff]  ;;  %v847_v14 = vld [vmem:[%s1171_s4 + $0xc0] sm:$0xff]  ;;  %v861_v16 = vld [vmem:[%s1171_s4 + $0xb8] sm:$0xff] }
   0x6   :  { %541 = vmatprep.subr.mxu0 %v777_v4  ;;  %585 = vmatprep.subr.mxu1 %v777_v4  ;;  %v840_v13 = vld [vmem:[%s1171_s4 + $0x48] sm:$0xff]  ;;  %v854_v15 = vld [vmem:[%s1171_s4 + $0x40] sm:$0xff]  ;;  %v868_v17 = vld [vmem:[%s1171_s4 + $0x38] sm:$0xff] }
   0x7   :  { %542 = vmatpush3.msra.mxu0 %v784_v5  ;;  %586 = vmatpush3.msra.mxu1 %v784_v5  ;;  %v875_v18 = vld [vmem:[%s1171_s4 + $0xb0] sm:$0xff]  ;;  %v889_v20 = vld [vmem:[%s1171_s4 + $0xa8] sm:$0xff]  ;;  %v903_v22 = vld [vmem:[%s1171_s4 + $0xa0] sm:$0xff] }
   0x8   :  { %543 = vmatprep.subr.mxu0 %v791_v6  ;;  %587 = vmatprep.subr.mxu1 %v791_v6  ;;  %v882_v19 = vld [vmem:[%s1171_s4 + $0x30] sm:$0xff]  ;;  %v896_v21 = vld [vmem:[%s1171_s4 + $0x28] sm:$0xff]  ;;  %v910_v23 = vld [vmem:[%s1171_s4 + $0x20] sm:$0xff] }
   0x9   :  { %544 = vmatpush3.msra.mxu0 %v798_v7  ;;  %588 = vmatpush3.msra.mxu1 %v798_v7  ;;  %v917_v24 = vld [vmem:[%s1171_s4 + $0x98] sm:$0xff]  ;;  %v931_v26 = vld [vmem:[%s1171_s4 + $0x90] sm:$0xff]  ;;  %v945_v28 = vld [vmem:[%s1171_s4 + $0x88] sm:$0xff] }
   0xa   :  { %545 = vmatprep.subr.mxu0 %v805_v8  ;;  %589 = vmatprep.subr.mxu1 %v805_v8  ;;  %v924_v25 = vld [vmem:[%s1171_s4 + $0x18] sm:$0xff]  ;;  %v938_v27 = vld [vmem:[%s1171_s4 + $0x10] sm:$0xff]  ;;  %v952_v29 = vld [vmem:[%s1171_s4 + $0x8] sm:$0xff] }
   0xb   :  { %546 = vmatpush3.msra.mxu0 %v812_v9  ;;  %590 = vmatpush3.msra.mxu1 %v812_v9  ;;  %v959_v30 = vld [vmem:[%s1171_s4 + $0x80] sm:$0xff]  ;;  %v56_v32 = vld [vmem:[%s1172_s0 + $0x8] sm:$0xff]  ;;  %v58_v36 = vld [vmem:[%s1172_s0 + $0x18] sm:$0xff] }
   0xc   :  { %547 = vmatprep.subr.mxu0 %v819_v10  ;;  %591 = vmatprep.subr.mxu1 %v819_v10  ;;  %v966_v31 = vld [vmem:[%s1171_s4] sm:$0xff]  ;;  %v166_v33 = vld [vmem:[%s1173_s1 + $0x8] sm:$0xff]  ;;  %v168_v37 = vld [vmem:[%s1173_s1 + $0x18] sm:$0xff] }
   0xd   :  { %548 = vmatpush3.msra.mxu0 %v826_v11  ;;  %592 = vmatpush3.msra.mxu1 %v826_v11  ;;  %v55_v34 = vld [vmem:[%s1172_s0] sm:$0xff]  ;;  %v57_v38 = vld [vmem:[%s1172_s0 + $0x10] sm:$0xff]  ;;  %v60_v40 = vld [vmem:[%s1172_s0 + $0x28] sm:$0xff] }
   0xe   :  { %549 = vmatprep.subr.mxu0 %v833_v12  ;;  %593 = vmatprep.subr.mxu1 %v833_v12  ;;  %v165_v35 = vld [vmem:[%s1173_s1] sm:$0xff]  ;;  %v167_v39 = vld [vmem:[%s1173_s1 + $0x10] sm:$0xff]  ;;  %v170_v41 = vld [vmem:[%s1173_s1 + $0x28] sm:$0xff] }
   0xf   :  { %550 = vmatpush3.msra.mxu0 %v840_v13  ;;  %594 = vmatpush3.msra.mxu1 %v840_v13  ;;  %v59_v42 = vld [vmem:[%s1172_s0 + $0x20] sm:$0xff]  ;;  %v62_v44 = vld [vmem:[%s1172_s0 + $0x38] sm:$0xff]  ;;  %v61_v46 = vld [vmem:[%s1172_s0 + $0x30] sm:$0xff] }
  0x10   :  { %551 = vmatprep.subr.mxu0 %v847_v14  ;;  %595 = vmatprep.subr.mxu1 %v847_v14  ;;  %v169_v43 = vld [vmem:[%s1173_s1 + $0x20] sm:$0xff]  ;;  %v172_v45 = vld [vmem:[%s1173_s1 + $0x38] sm:$0xff]  ;;  %v171_v47 = vld [vmem:[%s1173_s1 + $0x30] sm:$0xff] }
  0x11   :  { %552 = vmatpush3.msra.mxu0 %v854_v15  ;;  %596 = vmatpush3.msra.mxu1 %v854_v15  ;;  %v271_v48 = vld [vmem:[%s1174_s2 + $0x8] sm:$0xff]  ;;  %v270_v50 = vld [vmem:[%s1174_s2] sm:$0xff]  ;;  %v273_v52 = vld [vmem:[%s1174_s2 + $0x18] sm:$0xff] }
  0x12   :  { %553 = vmatprep.subr.mxu0 %v861_v16  ;;  %597 = vmatprep.subr.mxu1 %v861_v16  ;;  %v376_v49 = vld [vmem:[%s1175_s3 + $0x8] sm:$0xff]  ;;  %v375_v51 = vld [vmem:[%s1175_s3] sm:$0xff]  ;;  %v378_v53 = vld [vmem:[%s1175_s3 + $0x18] sm:$0xff] }
  0x13   :  { %554 = vmatpush3.msra.mxu0 %v868_v17  ;;  %598 = vmatpush3.msra.mxu1 %v868_v17  ;;  %v272_v54 = vld [vmem:[%s1174_s2 + $0x10] sm:$0xff]  ;;  %v275_v56 = vld [vmem:[%s1174_s2 + $0x28] sm:$0xff]  ;;  %v274_v58 = vld [vmem:[%s1174_s2 + $0x20] sm:$0xff] }
  0x14   :  { %555 = vmatprep.subr.mxu0 %v875_v18  ;;  %599 = vmatprep.subr.mxu1 %v875_v18  ;;  %v377_v55 = vld [vmem:[%s1175_s3 + $0x10] sm:$0xff]  ;;  %v380_v57 = vld [vmem:[%s1175_s3 + $0x28] sm:$0xff]  ;;  %v379_v59 = vld [vmem:[%s1175_s3 + $0x20] sm:$0xff] }
  0x15   :  { %556 = vmatpush3.msra.mxu0 %v882_v19  ;;  %600 = vmatpush3.msra.mxu1 %v882_v19  ;;  %v277_v60 = vld [vmem:[%s1174_s2 + $0x38] sm:$0xff]  ;;  %v276_v62 = vld [vmem:[%s1174_s2 + $0x30] sm:$0xff] }
  0x16   :  { %557 = vmatprep.subr.mxu0 %v889_v20  ;;  %601 = vmatprep.subr.mxu1 %v889_v20  ;;  %v382_v61 = vld [vmem:[%s1175_s3 + $0x38] sm:$0xff]  ;;  %v381_v63 = vld [vmem:[%s1175_s3 + $0x30] sm:$0xff] }
  0x17   :  { %558 = vmatpush3.msra.mxu0 %v896_v21  ;;  %602 = vmatpush3.msra.mxu1 %v896_v21 }
  0x18   :  { %559 = vmatprep.subr.mxu0 %v903_v22  ;;  %603 = vmatprep.subr.mxu1 %v903_v22 }
  0x19   :  { %560 = vmatpush3.msra.mxu0 %v910_v23  ;;  %604 = vmatpush3.msra.mxu1 %v910_v23 }
  0x1a   :  { %561 = vmatprep.subr.mxu0 %v917_v24  ;;  %605 = vmatprep.subr.mxu1 %v917_v24 }
  0x1b   :  { %562 = vmatpush3.msra.mxu0 %v924_v25  ;;  %606 = vmatpush3.msra.mxu1 %v924_v25 }
  0x1c   :  { %563 = vmatprep.subr.mxu0 %v931_v26  ;;  %607 = vmatprep.subr.mxu1 %v931_v26 }
  0x1d   :  { %564 = vmatpush3.msra.mxu0 %v938_v27  ;;  %608 = vmatpush3.msra.mxu1 %v938_v27 }
  0x1e   :  { %565 = vmatprep.subr.mxu0 %v945_v28  ;;  %609 = vmatprep.subr.mxu1 %v945_v28 }
  0x1f   :  { %566 = vmatpush3.msra.mxu0 %v952_v29  ;;  %610 = vmatpush3.msra.mxu1 %v952_v29 }
  0x20   :  { %567 = vmatprep.subr.mxu0 %v959_v30  ;;  %611 = vmatprep.subr.mxu1 %v959_v30 }
  0x21   :  { %568 = vmatpush3.msra.mxu0 %v966_v31  ;;  %517 = vmatprep.mubr.msk.f32.mxu0 %vm63_vm1, %v56_v32 }
  0x22   :  { %612 = vmatpush3.msra.mxu1 %v966_v31  ;;  %522 = vmatprep.mubr.msk.f32.mxu1 %vm63_vm1, %v166_v33 }
  0x23   :  { %145 = vmatmul.mubr.f32.vlgmr.msra.gmra.mxu0 %v55_v34  ;;  %250 = vmatmul.mubr.f32.vlgmr.msra.gmra.mxu1 %v165_v35 }
  0x24   :  { %625 = vmatprep.subr.msk.mxu0 %vm76_vm0, %v751_v0  ;;  %669 = vmatprep.subr.msk.mxu1 %vm76_vm0, %v751_v0 }
  0x25   :  { %626 = vmatpush3.msra.mxu0 %v756_v1  ;;  %670 = vmatpush3.msra.mxu1 %v756_v1 }
  0x26   :  { %627 = vmatprep.subr.mxu0 %v761_v2  ;;  %671 = vmatprep.subr.mxu1 %v761_v2 }
  0x27   :  { %628 = vmatpush3.msra.mxu0 %v770_v3  ;;  %672 = vmatpush3.msra.mxu1 %v770_v3 }
  0x28   :  { %629 = vmatprep.subr.mxu0 %v777_v4  ;;  %673 = vmatprep.subr.mxu1 %v777_v4 }
  0x29   :  { %630 = vmatpush3.msra.mxu0 %v784_v5  ;;  %674 = vmatpush3.msra.mxu1 %v784_v5 }
  0x2a   :  { %631 = vmatprep.subr.mxu0 %v791_v6  ;;  %675 = vmatprep.subr.mxu1 %v791_v6 }
  0x2b   :  { %632 = vmatpush3.msra.mxu0 %v798_v7  ;;  %676 = vmatpush3.msra.mxu1 %v798_v7 }
  0x2c   :  { %633 = vmatprep.subr.mxu0 %v805_v8  ;;  %677 = vmatprep.subr.mxu1 %v805_v8 }
  0x2d   :  { %634 = vmatpush3.msra.mxu0 %v812_v9  ;;  %678 = vmatpush3.msra.mxu1 %v812_v9 }
  0x2e   :  { %635 = vmatprep.subr.mxu0 %v819_v10  ;;  %679 = vmatprep.subr.mxu1 %v819_v10 }
  0x2f   :  { %636 = vmatpush3.msra.mxu0 %v826_v11  ;;  %680 = vmatpush3.msra.mxu1 %v826_v11 }
  0x30   :  { %637 = vmatprep.subr.mxu0 %v833_v12  ;;  %681 = vmatprep.subr.mxu1 %v833_v12 }
  0x31   :  { %638 = vmatpush3.msra.mxu0 %v840_v13  ;;  %682 = vmatpush3.msra.mxu1 %v840_v13 }
  0x32   :  { %639 = vmatprep.subr.mxu0 %v847_v14  ;;  %683 = vmatprep.subr.mxu1 %v847_v14 }
  0x33   :  { %640 = vmatpush3.msra.mxu0 %v854_v15  ;;  %684 = vmatpush3.msra.mxu1 %v854_v15 }
  0x34   :  { %641 = vmatprep.subr.mxu0 %v861_v16  ;;  %685 = vmatprep.subr.mxu1 %v861_v16 }
  0x35   :  { %518 = vmatprep.mubr.msk.f32.mxu0 %vm63_vm1, %v58_v36  ;;  %523 = vmatprep.mubr.msk.f32.mxu1 %vm63_vm1, %v168_v37 }
  0x36   :  { %642 = vmatpush3.msra.mxu0 %v868_v17  ;;  %686 = vmatpush3.msra.mxu1 %v868_v17 }
  0x37   :  { %150 = vmatmul.mubr.f32.gmra.mxu0 %v57_v38  ;;  %255 = vmatmul.mubr.f32.gmra.mxu1 %v167_v39 }
  0x38   :  { %643 = vmatprep.subr.mxu0 %v875_v18  ;;  %687 = vmatprep.subr.mxu1 %v875_v18 }
  0x39   :  { %644 = vmatpush3.msra.mxu0 %v882_v19  ;;  %688 = vmatpush3.msra.mxu1 %v882_v19 }
  0x3a   :  { %645 = vmatprep.subr.mxu0 %v889_v20  ;;  %689 = vmatprep.subr.mxu1 %v889_v20 }
  0x3b   :  { %519 = vmatprep.mubr.msk.f32.mxu0 %vm63_vm1, %v60_v40  ;;  %524 = vmatprep.mubr.msk.f32.mxu1 %vm63_vm1, %v170_v41 }
  0x3c   :  { %646 = vmatpush3.msra.mxu0 %v896_v21  ;;  %690 = vmatpush3.msra.mxu1 %v896_v21 }
  0x3d   :  { %155 = vmatmul.mubr.f32.gmra.mxu0 %v59_v42  ;;  %260 = vmatmul.mubr.f32.gmra.mxu1 %v169_v43 }
  0x3e   :  { %647 = vmatprep.subr.mxu0 %v903_v22  ;;  %691 = vmatprep.subr.mxu1 %v903_v22 }
  0x3f   :  { %648 = vmatpush3.msra.mxu0 %v910_v23  ;;  %692 = vmatpush3.msra.mxu1 %v910_v23 }
  0x40   :  { %649 = vmatprep.subr.mxu0 %v917_v24  ;;  %693 = vmatprep.subr.mxu1 %v917_v24 }
  0x41   :  { %520 = vmatprep.mubr.msk.f32.mxu0 %vm63_vm1, %v62_v44  ;;  %525 = vmatprep.mubr.msk.f32.mxu1 %vm63_vm1, %v172_v45 }
  0x42   :  { %650 = vmatpush3.msra.mxu0 %v924_v25  ;;  %694 = vmatpush3.msra.mxu1 %v924_v25 }
  0x43   :  { %160 = vmatmul.mubr.f32.gmra.mxu0 %v61_v46  ;;  %265 = vmatmul.mubr.f32.gmra.mxu1 %v171_v47 }
  0x44   :  { %651 = vmatprep.subr.mxu0 %v931_v26  ;;  %695 = vmatprep.subr.mxu1 %v931_v26 }
  0x45   :  { %652 = vmatpush3.msra.mxu0 %v938_v27  ;;  %696 = vmatpush3.msra.mxu1 %v938_v27 }
  0x46   :  { %653 = vmatprep.subr.mxu0 %v945_v28  ;;  %697 = vmatprep.subr.mxu1 %v945_v28 }
  0x47   :  { %654 = vmatpush3.msra.mxu0 %v952_v29  ;;  %698 = vmatpush3.msra.mxu1 %v952_v29 }
  0x48   :  { %655 = vmatprep.subr.mxu0 %v959_v30  ;;  %699 = vmatprep.subr.mxu1 %v959_v30  ;;  %v536_v30 = vld [vmem:[%s1176_s5] ss:$0 sm:$0xff] }
  0x49   :  { %656 = vmatpush3.msra.mxu0 %v966_v31  ;;  %527 = vmatprep.mubr.msk.f32.mxu0 %vm63_vm1, %v271_v48 }
  0x4a   :  { %700 = vmatpush3.msra.mxu1 %v966_v31  ;;  %532 = vmatprep.mubr.msk.f32.mxu1 %vm63_vm1, %v376_v49 }
  0x4b   :  { %355 = vmatmul.mubr.f32.vlgmr.msra.gmra.mxu0 %v270_v50  ;;  %460 = vmatmul.mubr.f32.vlgmr.msra.gmra.mxu1 %v375_v51 }
  0x4c   :  { %528 = vmatprep.mubr.msk.f32.mxu0 %vm63_vm1, %v273_v52  ;;  %533 = vmatprep.mubr.msk.f32.mxu1 %vm63_vm1, %v378_v53 }
  0x4f   :  { %360 = vmatmul.mubr.f32.gmra.mxu0 %v272_v54  ;;  %465 = vmatmul.mubr.f32.gmra.mxu1 %v377_v55 }
  0x50   :  { %529 = vmatprep.mubr.msk.f32.mxu0 %vm63_vm1, %v275_v56  ;;  %534 = vmatprep.mubr.msk.f32.mxu1 %vm63_vm1, %v380_v57 }
  0x53   :  { %365 = vmatmul.mubr.f32.gmra.mxu0 %v274_v58  ;;  %470 = vmatmul.mubr.f32.gmra.mxu1 %v379_v59 }
  0x54   :  { %530 = vmatprep.mubr.msk.f32.mxu0 %vm63_vm1, %v277_v60  ;;  %535 = vmatprep.mubr.msk.f32.mxu1 %vm63_vm1, %v382_v61 }
  0x57   :  { %370 = vmatmul.mubr.f32.gmra.mxu0 %v276_v62  ;;  %475 = vmatmul.mubr.f32.gmra.mxu1 %v381_v63 }
  0xe3   :  { %v569_v0 = vpop.f32.mrf.mxu0  ;;  %v613_v1 = vpop.f32.mrf.mxu1 }
  0xe5   :  { %v570_v2 = vpop.f32.mrf.mxu0  ;;  %v614_v3 = vpop.f32.mrf.mxu1 }
  0xe6   :  { %v571_v18 = vadd.f32 %v570_v2, %v569_v0  ;;  %v615_v19 = vadd.f32 %v614_v3, %v613_v1 }
  0xe8   :  { %v480_v26 = vmax.f32 %v571_v18, %v615_v19 }
  0xf7   :  { %v572_v4 = vpop.f32.mrf.mxu0  ;;  %v616_v5 = vpop.f32.mrf.mxu1 }
  0xf9   :  { %v573_v6 = vpop.f32.mrf.mxu0  ;;  %v617_v7 = vpop.f32.mrf.mxu1 }
  0xfa   :  { %v574_v27 = vadd.f32 %v573_v6, %v572_v4  ;;  %v618_v28 = vadd.f32 %v617_v7, %v616_v5 }
  0xfc   :  { %v481_v40 = vmax.f32 %v574_v27, %v618_v28 }
  0xfd   :  { %v575_v8 = vpop.f32.mrf.mxu0  ;;  %v619_v9 = vpop.f32.mrf.mxu1 }
  0xff   :  { %v576_v10 = vpop.f32.mrf.mxu0  ;;  %v620_v11 = vpop.f32.mrf.mxu1 }
 0x100   :  { %v577_v36 = vadd.f32 %v576_v10, %v575_v8  ;;  %v621_v37 = vadd.f32 %v620_v11, %v619_v9 }
 0x102   :  { %v482_v49 = vmax.f32 %v577_v36, %v621_v37 }
 0x103   :  { %v578_v12 = vpop.f32.mrf.mxu0  ;;  %v622_v13 = vpop.f32.mrf.mxu1 }
 0x105   :  { %v579_v14 = vpop.f32.mrf.mxu0  ;;  %v623_v15 = vpop.f32.mrf.mxu1 }
 0x106   :  { %v580_v52 = vadd.f32 %v579_v14, %v578_v12  ;;  %v624_v53 = vadd.f32 %v623_v15, %v622_v13 }
 0x108   :  { %v483_v62 = vmax.f32 %v580_v52, %v624_v53 }
 0x10b   :  { %v657_v16 = vpop.f32.mrf.mxu0  ;;  %v701_v17 = vpop.f32.mrf.mxu1 }
 0x10d   :  { %v658_v20 = vpop.f32.mrf.mxu0  ;;  %v702_v21 = vpop.f32.mrf.mxu1 }
 0x10e   :  { %v659_v22 = vadd.f32 %v658_v20, %v657_v16  ;;  %v703_v23 = vadd.f32 %v702_v21, %v701_v17 }
 0x10f   :  { %v660_v24 = vpop.f32.mrf.mxu0  ;;  %v704_v25 = vpop.f32.mrf.mxu1 }
 0x110   :  { %v484_v29 = vmax.f32 %v659_v22, %v703_v23 }
 0x111   :  { %v661_v31 = vpop.f32.mrf.mxu0  ;;  %v705_v32 = vpop.f32.mrf.mxu1 }
 0x112   :  { %v488_v33 = vmax.f32 %v480_v26, %v484_v29  ;;  %v662_v34 = vadd.f32 %v661_v31, %v660_v24  ;;  %v706_v35 = vadd.f32 %v705_v32, %v704_v25 }
 0x113   :  { %v663_v38 = vpop.f32.mrf.mxu0  ;;  %v707_v39 = vpop.f32.mrf.mxu1 }
 0x114   :  { %v499_v41 = vadd.f32 %v536_v30, %v488_v33  ;;  %v485_v42 = vmax.f32 %v662_v34, %v706_v35 }
 0x115   :  { %v664_v43 = vpop.f32.mrf.mxu0  ;;  %v708_v44 = vpop.f32.mrf.mxu1 }
 0x116   :  { %v503_v45 = vmax.f32 %v499_v41, 0.0  ;;  %v489_v46 = vmax.f32 %v481_v40, %v485_v42  ;;  %v665_v47 = vadd.f32 %v664_v43, %v663_v38  ;;  %v709_v48 = vadd.f32 %v708_v44, %v707_v39 }
 0x117   :  { %v666_v50 = vpop.f32.mrf.mxu0  ;;  %v710_v51 = vpop.f32.mrf.mxu1 }
 0x118   :  { %508 = vst.msk [vmem:[%s1177_s6] sm:$0xff] %vm507_vm2, %v503_v45  ;;  %v500_v54 = vadd.f32 %v536_v30, %v489_v46  ;;  %v486_v55 = vmax.f32 %v665_v47, %v709_v48 }
 0x119   :  { %v667_v56 = vpop.f32.mrf.mxu0  ;;  %v711_v57 = vpop.f32.mrf.mxu1 }
 0x11a   :  { %v504_v58 = vmax.f32 %v500_v54, 0.0  ;;  %v490_v59 = vmax.f32 %v482_v49, %v486_v55  ;;  %v668_v60 = vadd.f32 %v667_v56, %v666_v50  ;;  %v712_v61 = vadd.f32 %v711_v57, %v710_v51 }
 0x11c   :  { %509 = vst.msk [vmem:[%s1177_s6 + $0x8] sm:$0xff] %vm507_vm2, %v504_v58  ;;  %v501_v63 = vadd.f32 %v536_v30, %v490_v59  ;;  %v487_v0 = vmax.f32 %v668_v60, %v712_v61 }
 0x11e   :  { %v505_v1 = vmax.f32 %v501_v63, 0.0  ;;  %v491_v2 = vmax.f32 %v483_v62, %v487_v0 }
 0x120   :  { %510 = vst.msk [vmem:[%s1177_s6 + $0x10] sm:$0xff] %vm507_vm2, %v505_v1  ;;  %v502_v3 = vadd.f32 %v536_v30, %v491_v2 }
 0x122   :  { %v506_v4 = vmax.f32 %v502_v3, 0.0 }
 0x124   :  { %511 = vst.msk [vmem:[%s1177_s6 + $0x18] sm:$0xff] %vm507_vm2, %v506_v4 }

// kernel: forward.5
= control target key start
LH: loop header
LB: loop body
LE: loop exit
PB: predicated region body
PF: predicated region fallthrough
CT: control target
= control target key end

     0   :  { %v425_v3 = vmov 0.0   ;;  %vm426_vm0 = vmmov 0   ;;  %vm70_vm1 = vcmask 523264   ;;  %vm233_vm2 = vcmask 1041408   ;;  %s638_s1 = inlined_call_operand.vmem [shape: f32[320,50], index: 1, kind: input, shape index: {}]   ;;  %s639_s0 = inlined_call_operand.vmem [shape: f32[8,320], index: 0, kind: input, shape index: {}]   ;;  %s640_s3 = inlined_call_operand.vmem [shape: f32[50,10], index: 3, kind: input, shape index: {}]   ;;  %s641_s2 = inlined_call_operand.vmem [shape: f32[1,50], index: 2, kind: input, shape index: {}]   ;;  %s642_s4 = inlined_call_operand.vmem [shape: f32[1,10], index: 4, kind: input, shape index: {}]   ;;  %s643_s5 = inlined_call_operand.vmem [shape: f32[8,10], index: 5, kind: output, shape index: {}]  }
   0x1   :  { %v54_v0 = vld [vmem:[%s638_s1 + $0xf8] sm:$0xff]  ;;  %v53_v2 = vld [vmem:[%s638_s1 + $0xf0] sm:$0xff]  ;;  %383 = vmatprep.subr.mxu1 %v425_v3  ;;  %399 = vmatprep.mubr.msk.f32.mxu1 %vm426_vm0, %v425_v3  ;;  %v52_v5 = vld [vmem:[%s638_s1 + $0xe8] sm:$0xff]  ;;  %vm229_vm3 = vcmask 408576   ;;  %vm307_vm4 = vcmask 80896  }
   0x2   :  { %v38_v1 = vld [vmem:[%s638_s1 + $0x78] sm:$0xff]  ;;  %331 = vmatprep.subr.mxu0 %v54_v0  ;;  %v37_v4 = vld [vmem:[%s638_s1 + $0x70] sm:$0xff]  ;;  %v36_v6 = vld [vmem:[%s638_s1 + $0x68] sm:$0xff] }
   0x3   :  { %332 = vmatpush3.msra.mxu0 %v38_v1  ;;  %v51_v7 = vld [vmem:[%s638_s1 + $0xe0] sm:$0xff]  ;;  %v50_v9 = vld [vmem:[%s638_s1 + $0xd8] sm:$0xff]  ;;  %v49_v12 = vld [vmem:[%s638_s1 + $0xd0] sm:$0xff] }
   0x4   :  { %333 = vmatprep.subr.mxu0 %v53_v2  ;;  %v35_v8 = vld [vmem:[%s638_s1 + $0x60] sm:$0xff]  ;;  %v34_v10 = vld [vmem:[%s638_s1 + $0x58] sm:$0xff]  ;;  %v61_v13 = vld [vmem:[%s638_s1 + $0x130] sm:$0xff] }
   0x5   :  { %334 = vmatpush3.msra.mxu0 %v37_v4  ;;  %v62_v11 = vld [vmem:[%s638_s1 + $0x138] sm:$0xff]  ;;  %v33_v14 = vld [vmem:[%s638_s1 + $0x50] sm:$0xff]  ;;  %v60_v15 = vld [vmem:[%s638_s1 + $0x128] sm:$0xff] }
   0x6   :  { %335 = vmatprep.subr.mxu0 %v52_v5  ;;  %384 = vmatpush3.msra.mxu1 %v62_v11  ;;  %v48_v16 = vld [vmem:[%s638_s1 + $0xc8] sm:$0xff]  ;;  %v59_v18 = vld [vmem:[%s638_s1 + $0x120] sm:$0xff]  ;;  %v58_v21 = vld [vmem:[%s638_s1 + $0x118] sm:$0xff] }
   0x7   :  { %336 = vmatpush3.msra.mxu0 %v36_v6  ;;  %385 = vmatprep.subr.mxu1 %v425_v3  ;;  %v32_v17 = vld [vmem:[%s638_s1 + $0x48] sm:$0xff]  ;;  %v47_v19 = vld [vmem:[%s638_s1 + $0xc0] sm:$0xff]  ;;  %v46_v22 = vld [vmem:[%s638_s1 + $0xb8] sm:$0xff] }
   0x8   :  { %337 = vmatprep.subr.mxu0 %v51_v7  ;;  %386 = vmatpush3.msra.mxu1 %v61_v13  ;;  %v31_v20 = vld [vmem:[%s638_s1 + $0x40] sm:$0xff]  ;;  %v30_v23 = vld [vmem:[%s638_s1 + $0x38] sm:$0xff]  ;;  %v21_v24 = vld [vmem:[%s639_s0 + $0x8] sm:$0xff] }
   0x9   :  { %338 = vmatpush3.msra.mxu0 %v35_v8  ;;  %387 = vmatprep.subr.mxu1 %v425_v3  ;;  %v45_v25 = vld [vmem:[%s638_s1 + $0xb0] sm:$0xff]  ;;  %v44_v28 = vld [vmem:[%s638_s1 + $0xa8] sm:$0xff]  ;;  %v43_v31 = vld [vmem:[%s638_s1 + $0xa0] sm:$0xff] }
   0xa   :  { %339 = vmatprep.subr.mxu0 %v50_v9  ;;  %388 = vmatpush3.msra.mxu1 %v60_v15  ;;  %v57_v26 = vld [vmem:[%s638_s1 + $0x110] sm:$0xff]  ;;  %v56_v29 = vld [vmem:[%s638_s1 + $0x108] sm:$0xff]  ;;  %v55_v32 = vld [vmem:[%s638_s1 + $0x100] sm:$0xff] }
   0xb   :  { %340 = vmatpush3.msra.mxu0 %v34_v10  ;;  %389 = vmatprep.subr.mxu1 %v425_v3  ;;  %v29_v27 = vld [vmem:[%s638_s1 + $0x30] sm:$0xff]  ;;  %v28_v30 = vld [vmem:[%s638_s1 + $0x28] sm:$0xff]  ;;  %v27_v33 = vld [vmem:[%s638_s1 + $0x20] sm:$0xff] }
   0xc   :  { %341 = vmatprep.subr.mxu0 %v49_v12  ;;  %390 = vmatpush3.msra.mxu1 %v59_v18  ;;  %v22_v34 = vld [vmem:[%s639_s0 + $0x10] sm:$0xff]  ;;  %v42_v35 = vld [vmem:[%s638_s1 + $0x98] sm:$0xff]  ;;  %v40_v40 = vld [vmem:[%s638_s1 + $0x88] sm:$0xff] }
   0xd   :  { %342 = vmatpush3.msra.mxu0 %v33_v14  ;;  %391 = vmatprep.subr.mxu1 %v425_v3  ;;  %v26_v36 = vld [vmem:[%s638_s1 + $0x18] sm:$0xff]  ;;  %v221_v37 = vld [vmem:[%s640_s3 + $0x30] sm:$0x3]  ;;  %v24_v41 = vld [vmem:[%s638_s1 + $0x8] sm:$0xff] }
   0xe   :  { %343 = vmatprep.subr.mxu0 %v48_v16  ;;  %392 = vmatpush3.msra.mxu1 %v58_v21  ;;  %v41_v38 = vld [vmem:[%s638_s1 + $0x90] sm:$0xff]  ;;  %v39_v42 = vld [vmem:[%s638_s1 + $0x80] sm:$0xff]  ;;  %v220_v45 = vld [vmem:[%s640_s3 + $0x28] sm:$0xff] }
   0xf   :  { %344 = vmatpush3.msra.mxu0 %v32_v17  ;;  %393 = vmatprep.subr.mxu1 %v425_v3  ;;  %v25_v39 = vld [vmem:[%s638_s1 + $0x10] sm:$0xff]  ;;  %v23_v43 = vld [vmem:[%s638_s1] sm:$0xff]  ;;  %v218_v47 = vld [vmem:[%s640_s3 + $0x18] sm:$0xff] }
  0x10   :  { %345 = vmatprep.subr.mxu0 %v47_v19  ;;  %138 = vmatprep.mubr.f32.mxu0 %v21_v24  ;;  %v20_v44 = vld [vmem:[%s639_s0] sm:$0xff]  ;;  %v217_v48 = vld [vmem:[%s640_s3 + $0x10] sm:$0xff]  ;;  %v216_v49 = vld [vmem:[%s640_s3 + $0x8] sm:$0xff] }
  0x11   :  { %346 = vmatpush3.msra.mxu0 %v31_v20  ;;  %394 = vmatpush3.msra.mxu1 %v57_v26  ;;  %v219_v46 = vld [vmem:[%s640_s3 + $0x20] sm:$0xff] }
  0x12   :  { %347 = vmatprep.subr.mxu0 %v46_v22  ;;  %395 = vmatprep.subr.mxu1 %v425_v3  ;;  %v215_v50 = vld [vmem:[%s640_s3] sm:$0xff] }
  0x13   :  { %348 = vmatpush3.msra.mxu0 %v30_v23  ;;  %396 = vmatpush3.msra.mxu1 %v56_v29  ;;  %v326_v55 = vld [vmem:[%s641_s2] ss:$0 sm:$0xff] }
  0x14   :  { %349 = vmatprep.subr.mxu0 %v45_v25  ;;  %397 = vmatprep.subr.mxu1 %v425_v3  ;;  %v328_v60 = vld [vmem:[%s642_s4] ss:$0 sm:$0xff] }
  0x15   :  { %350 = vmatpush3.msra.mxu0 %v29_v27  ;;  %398 = vmatpush3.msra.mxu1 %v55_v32 }
  0x16   :  { %351 = vmatprep.subr.mxu0 %v44_v28  ;;  %400 = vmatmul.mubr.msk.f32.vlgmr.msra.gmra.mxu1 %vm70_vm1, %v22_v34 }
  0x17   :  { %352 = vmatpush3.msra.mxu0 %v28_v30  ;;  %402 = vmatprep.subr.mxu1 %v425_v3 }
  0x18   :  { %353 = vmatprep.subr.mxu0 %v43_v31  ;;  %403 = vmatpush3.msk.msra.mxu1 %vm233_vm2, %v221_v37 }
  0x19   :  { %354 = vmatpush3.msra.mxu0 %v27_v33  ;;  %404 = vmatprep.subr.mxu1 %v425_v3 }
  0x1a   :  { %355 = vmatprep.subr.mxu0 %v42_v35  ;;  %416 = vmatprep.mubr.msk.f32.mxu1 %vm426_vm0, %v425_v3 }
  0x1b   :  { %356 = vmatpush3.msra.mxu0 %v26_v36  ;;  %405 = vmatpush3.msra.mxu1 %v220_v45 }
  0x1c   :  { %357 = vmatprep.subr.mxu0 %v41_v38  ;;  %406 = vmatprep.subr.mxu1 %v425_v3 }
  0x1d   :  { %358 = vmatpush3.msra.mxu0 %v25_v39  ;;  %407 = vmatpush3.msra.mxu1 %v219_v46 }
  0x1e   :  { %359 = vmatprep.subr.mxu0 %v40_v40  ;;  %408 = vmatprep.subr.mxu1 %v425_v3 }
  0x1f   :  { %360 = vmatpush3.msra.mxu0 %v24_v41  ;;  %409 = vmatpush3.msra.mxu1 %v218_v47 }
  0x20   :  { %361 = vmatprep.subr.mxu0 %v39_v42  ;;  %410 = vmatprep.subr.mxu1 %v425_v3 }
  0x21   :  { %362 = vmatpush3.msra.mxu0 %v23_v43  ;;  %411 = vmatpush3.msra.mxu1 %v217_v48 }
  0x22   :  { %139 = vmatmul.mubr.f32.vlgmr.msra.gmra.mxu0 %v20_v44  ;;  %412 = vmatprep.subr.mxu1 %v425_v3 }
  0x23   :  { %413 = vmatpush3.msra.mxu1 %v216_v49 }
  0x24   :  { %414 = vmatprep.subr.mxu1 %v425_v3 }
  0x25   :  { %415 = vmatpush3.msra.mxu1 %v215_v50 }
  0xd6   :  { %v210_v51 = vpop.f32.mrf.mxu1 }
  0xd8   :  { %v401_v52 = vpop.f32.mrf.mxu1 }
  0xe2   :  { %v363_v53 = vpop.f32.mrf.mxu0 }
  0xe4   :  { %v364_v54 = vpop.f32.mrf.mxu0 }
  0xe5   :  { %v365_v56 = vadd.f32 %v364_v54, %v363_v53 }
  0xe7   :  { %v141_v57 = vadd.f32 %v365_v56, %v326_v55 }
  0xe9   :  { %v211_v58 = vadd.f32 %v210_v51, %v141_v57 }
  0xeb   :  { %v214_v59 = vmax.f32 %v211_v58, 0.0 }
  0xed   :  { %417 = vmatmul.mubr.msk.f32.vlgmr.msra.gmra.mxu1 %vm229_vm3, %v214_v59 }
 0x1ad   :  { %v303_v61 = vpop.f32.mrf.mxu1 }
 0x1ae   :  { %v304_v62 = vadd.f32 %v328_v60, %v303_v61 }
 0x1af   :  { %v418_v63 = vpop.f32.mrf.mxu1 }
 0x1b0   :  { %v308_v0 = vsel %vm307_vm4, %v304_v62, -inf }
 0x1b1   :  { %309 = vmax.xlane.f32.xlu0 %v308_v0 }
 0x23a   :  { %v310_v1 = vpop.xlane.xlu0 %309 }
 0x23b   :  { %v311_v2 = vsub.f32 %v304_v62, %v310_v1 }
 0x23d   :  { %v312_v3 = vmul.f32 1.442695, %v311_v2 }
 0x23f   :  { %421 = vpow2.f32 %v312_v3 }
 0x24c   :  { %v422_v4 = vpop.eup %421 }
 0x24d   :  { %v314_v5 = vsel %vm307_vm4, %v422_v4, 0.0 }
 0x24e   :  { %315 = vadd.xlane.f32.xlu0 %v314_v5 }
 0x2d7   :  { %v316_v6 = vpop.xlane.xlu0 %315 }
 0x2d8   :  { %423 = vlog2.f32 %v316_v6 }
 0x2e5   :  { %v424_v7 = vpop.eup %423 }
 0x2e6   :  { %v318_v8 = vmul.f32 0.6931472, %v424_v7 }
 0x2e8   :  { %v319_v9 = vadd.f32 %v318_v8, %v310_v1 }
 0x2ea   :  { %v320_v10 = vsub.f32 %v304_v62, %v319_v9 }
 0x2ec   :  { %321 = vst.msk [vmem:[%s643_s5] sm:$0xff] %vm307_vm4, %v320_v10 }

</bundles_post_ra>
